<compile_context>
chip_gen: v7x
topology: tpu7x:2x2x1
jax: 0.10.0
libtpu: 0.0.40
codegen_flags: <defaults>
</compile_context>

<pallas_src>
import jax
import jax.numpy as jnp
from jax.experimental import pallas as pl
from jax.experimental.pallas import tpu as pltpu

HIDDEN = 32             # hidden_channels
NUM_STATE_FEATURES = 8  # num_of_state_features
NUM_HOPS_1 = 2
NUM_HOPS_2 = 3
NUM_RELATIONS = 3       # RGCNConv num_relations
GAME_FEAT = 7           # fixed by the module (conv10 / conv3 dst input dim)
EDGE_ATTR_DIM = 2       # ResGatedGraphConv edge_dim

# Rows of the packed (13, HIDDEN) bias block inside the weight slab.
(B_CONV10, B_CONV1, B_K, B_Q, B_V, B_CONV3, B_CONV32, B_CONV4, B_CONV42,
 B_CONV2, B_CONV5, B_LIN, B_LAST) = range(13)

# ---------------------------------------------------------------------------
# Static layout of the single packed weight/bias slab: (rows, 32) f32, every
# block at lane offset 0, row offsets padded to multiples of 8.
# ---------------------------------------------------------------------------
_W_BLOCKS = (
    [("tag10_%d" % k, GAME_FEAT, HIDDEN) for k in range(NUM_HOPS_1 + 1)]
    + [("rgcn_%d" % r, HIDDEN, HIDDEN) for r in range(NUM_RELATIONS)]
    + [("rgcn_root", HIDDEN, HIDDEN),
       ("k_x", GAME_FEAT, HIDDEN), ("skip", GAME_FEAT, HIDDEN),
       ("q_x", HIDDEN, HIDDEN), ("v_x", HIDDEN, HIDDEN),
       ("k_e", EDGE_ATTR_DIM, HIDDEN), ("q_e", EDGE_ATTR_DIM, HIDDEN),
       ("v_e", EDGE_ATTR_DIM, HIDDEN),
       ("sage32_l", HIDDEN, HIDDEN), ("sage32_r", HIDDEN, HIDDEN),
       ("sage4_l", HIDDEN, HIDDEN), ("sage4_r", HIDDEN, HIDDEN),
       ("sage42_l", HIDDEN, HIDDEN), ("sage42_r", HIDDEN, HIDDEN)]
    + [("tag2_%d" % k, HIDDEN, HIDDEN) for k in range(NUM_HOPS_2 + 1)]
    + [("sage5_l", HIDDEN, HIDDEN), ("sage5_r", HIDDEN, HIDDEN),
       ("lin", HIDDEN, NUM_STATE_FEATURES), ("last_t", 1, NUM_STATE_FEATURES),
       ("bias", 13, HIDDEN)]
)


def _weight_offsets():
    offs, r = {}, 0
    for name, rows, _ in _W_BLOCKS:
        offs[name] = r
        r += rows + ((-rows) % 8)
    return offs, r


_W_OFFS, _W_ROWS = _weight_offsets()


# ---------------------------------------------------------------------------
# In-kernel helpers (trace-time; everything stays VMEM resident).
# ---------------------------------------------------------------------------
def _mm(a, b):
    return jnp.dot(a, b, preferred_element_type=jnp.float32)


def _mmb(a, b):
    # bf16 operands -> single-pass MXU, f32 accumulation.  One-hots / masks are
    # exact in bf16; gathered activations get bf16-rounded once.
    return jnp.dot(a.astype(jnp.bfloat16), b.astype(jnp.bfloat16),
                   preferred_element_type=jnp.float32)


def _onehot_rows(idx_col, n):
    """(E,1) int32 -> (E,n) gather matrix (gather = oh @ x). OOB/-1 -> zero row."""
    e = idx_col.shape[0]
    return (jax.lax.broadcasted_iota(jnp.int32, (e, n), 1) == idx_col).astype(jnp.float32)


def _onehot_cols(idx_row, n):
    """(1,E) int32 -> (n,E) scatter matrix (scatter-sum = oh @ msg). OOB/-1 -> zero col."""
    e = idx_row.shape[1]
    return (jax.lax.broadcasted_iota(jnp.int32, (n, e), 0) == idx_row).astype(jnp.float32)


def _inv_deg(scatter_oh_f32):
    """Row-degree reciprocal for mean aggregation (zero-degree rows -> scale 1)."""
    deg = jnp.sum(scatter_oh_f32, axis=1, keepdims=True)
    return pl.reciprocal(jnp.maximum(deg, 1.0), approx=True)


# ---------------------------------------------------------------------------
# The fused kernel (built as a closure over the static per-call sizes).
# ---------------------------------------------------------------------------
def _make_kernel(ng, ns, e_vv, e_h, e_in, e_ss, d_offs):
    H, F = HIDDEN, NUM_STATE_FEATURES
    og, os_, oe = d_offs

    def kernel(d_ref, icol_ref, irow_ref, w_ref, out_ref):
        def W(name, rows=H, cols=H):
            o = _W_OFFS[name]
            return w_ref[o:o + rows, :cols]

        bias_blk = w_ref[_W_OFFS["bias"]:_W_OFFS["bias"] + 13, :]

        def B(i, cols=H):
            return bias_blk[i:i + 1, :cols]

        # ---- packed data slab: node features + edge attributes -------------
        game_x = d_ref[og:og + ng, :GAME_FEAT]          # (NG, 7)
        state_x = d_ref[os_:os_ + ns, :GAME_FEAT]       # (NS, 7)
        eattr = d_ref[oe:oe + e_h, :EDGE_ATTR_DIM]      # (Eh, 2)

        # ---- packed edge indices -------------------------------------------
        vv_src_c = icol_ref[0:e_vv, 0:1]
        vv_type_c = icol_ref[0:e_vv, 1:2]
        h_src_c = icol_ref[0:e_h, 2:3]
        h_dst_c = icol_ref[0:e_h, 3:4]
        in_src_c = icol_ref[0:e_in, 4:5]
        ss_src_c = icol_ref[0:e_ss, 5:6]
        vv_dst_r = irow_ref[0:1, 0:e_vv]
        h_dst_r = irow_ref[1:2, 0:e_h]
        in_dst_r = irow_ref[2:3, 0:e_in]
        ss_dst_r = irow_ref[3:4, 0:e_ss]

        # ---- one-hot gather / scatter operands (bf16 for the MXU) ----------
        vv_g = _onehot_rows(vv_src_c, ng).astype(jnp.bfloat16)   # (Evv, NG)
        vv_s = _onehot_cols(vv_dst_r, ng).astype(jnp.bfloat16)   # (NG, Evv)
        h_g = _onehot_rows(h_src_c, ng).astype(jnp.bfloat16)     # (Eh, NG)
        hk_g = _onehot_rows(h_dst_c, ns).astype(jnp.bfloat16)    # (Eh, NS)
        h_s_f = _onehot_cols(h_dst_r, ns)                        # (NS, Eh)
        in_g = _onehot_rows(in_src_c, ng).astype(jnp.bfloat16)   # (Ein, NG)
        in_s_f = _onehot_cols(in_dst_r, ns)                      # (NS, Ein)
        ss_g = _onehot_rows(ss_src_c, ns).astype(jnp.bfloat16)   # (Ess, NS)
        ss_s_f = _onehot_cols(ss_dst_r, ns)                      # (NS, Ess)

        inv_deg_h = _inv_deg(h_s_f)
        inv_deg_in = _inv_deg(in_s_f)
        inv_deg_ss = _inv_deg(ss_s_f)
        h_s = h_s_f.astype(jnp.bfloat16)
        in_s = in_s_f.astype(jnp.bfloat16)
        ss_s = ss_s_f.astype(jnp.bfloat16)

        def agg_vv(x):   # sum aggregation over v-v edges (factored, no (NG,NG) adj)
            return _mmb(vv_s, _mmb(vv_g, x))

        def agg_ss(x):   # sum aggregation over s-s edges
            return _mmb(ss_s, _mmb(ss_g, x))

        # ---- conv10: TAGConv(7 -> H, K=2, sum agg), relu --------------------
        acc = _mm(game_x, W("tag10_0", GAME_FEAT)) + B(B_CONV10)
        hop = game_x
        for k in range(1, NUM_HOPS_1 + 1):
            hop = agg_vv(hop)
            acc += _mm(hop, W("tag10_%d" % k, GAME_FEAT))
        game_h = jnp.maximum(acc, 0.0)

        # ---- conv1: RGCNConv(H -> H, 3 relations, mean agg), relu -----------
        src_feat = _mmb(vv_g, game_h)                            # (Evv, H)
        rel_oh = (jax.lax.broadcasted_iota(jnp.int32, (e_vv, NUM_RELATIONS), 1)
                  == vv_type_c).astype(jnp.float32)              # (Evv, 3)
        deg_rel = _mmb(vv_s, rel_oh)                             # (NG, 3) exact counts
        acc = _mm(game_h, W("rgcn_root")) + B(B_CONV1)
        for r in range(NUM_RELATIONS):
            m_r = src_feat * (vv_type_c == r).astype(jnp.float32)
            s_r = _mmb(vv_s, m_r)                                # per-relation sum
            inv = pl.reciprocal(jnp.maximum(deg_rel[:, r:r + 1], 1.0), approx=True)
            acc += _mm(s_r * inv, W("rgcn_%d" % r))
        game_h = jnp.maximum(acc, 0.0)

        # ---- conv3: ResGatedGraphConv((H,7) -> H, edge_dim=2, sum), relu ----
        # (key from dst state_x, query/value from src game_h, per-edge edge-attr
        #  linears added to k/q/v; skip = lin_skip(state_x) without bias.)
        g_src = _mmb(h_g, game_h)                                # (Eh, H) shared gather
        k_nodes = _mm(state_x, W("k_x", GAME_FEAT))
        skip = _mm(state_x, W("skip", GAME_FEAT))
        k_e = _mmb(hk_g, k_nodes) + _mm(eattr, W("k_e", EDGE_ATTR_DIM)) + B(B_K)
        q_e = _mm(g_src, W("q_x")) + _mm(eattr, W("q_e", EDGE_ATTR_DIM)) + B(B_Q)
        v_e = _mm(g_src, W("v_x")) + _mm(eattr, W("v_e", EDGE_ATTR_DIM)) + B(B_V)
        msg = jax.nn.sigmoid(k_e + q_e) * v_e                    # (Eh, H)
        sc = _mmb(h_s, jnp.concatenate([msg, g_src], axis=1))    # fused scatter (NS, 2H)
        state_h = jnp.maximum(sc[:, :H] + skip + B(B_CONV3), 0.0)

        # ---- conv32: SAGEConv over history v->s edges (mean agg), relu ------
        agg32 = sc[:, H:] * inv_deg_h
        state_h = jnp.maximum(_mm(agg32, W("sage32_l")) + _mm(state_h, W("sage32_r"))
                              + B(B_CONV32), 0.0)

        # ---- conv4 / conv42: SAGEConv over "in" v->s edges (mean agg), relu -
        agg_in = _mmb(in_s, _mmb(in_g, game_h)) * inv_deg_in
        state_h = jnp.maximum(_mm(agg_in, W("sage4_l")) + _mm(state_h, W("sage4_r"))
                              + B(B_CONV4), 0.0)
        state_h = jnp.maximum(_mm(agg_in, W("sage42_l")) + _mm(state_h, W("sage42_r"))
                              + B(B_CONV42), 0.0)

        # ---- conv2: TAGConv(H -> H, K=3, sum agg), relu ----------------------
        acc = _mm(state_h, W("tag2_0")) + B(B_CONV2)
        hop = state_h
        for k in range(1, NUM_HOPS_2 + 1):
            hop = agg_ss(hop)
            acc += _mm(hop, W("tag2_%d" % k))
        state_h = jnp.maximum(acc, 0.0)

        # ---- conv5: SAGEConv over s-s edges (mean agg), relu ----------------
        agg5 = agg_ss(state_h) * inv_deg_ss
        state_h = jnp.maximum(_mm(agg5, W("sage5_l")) + _mm(state_h, W("sage5_r"))
                              + B(B_CONV5), 0.0)

        # ---- lin -> relu -> lin_last -> log_softmax over state nodes --------
        hfeat = jnp.maximum(_mm(state_h, W("lin", H, F)) + B(B_LIN, F), 0.0)   # (NS, F)
        # Lane-dense logits: (1, F) x (NS, F)^T -> (1, NS)  (NT dot_general).
        z = jax.lax.dot_general(W("last_t", 1, F), hfeat,
                                (((1,), (1,)), ((), ())),
                                preferred_element_type=jnp.float32)
        z = z + bias_blk[B_LAST:B_LAST + 1, 0:1]
        m = jnp.max(z, axis=1, keepdims=True)
        lse = jnp.log(jnp.sum(jnp.exp(z - m), axis=1, keepdims=True)) + m
        out_ref[...] = z - lse                                   # (1, NS), lane-dense store

    return kernel


# ---------------------------------------------------------------------------
# Parameters: per-module tensors (same shapes as the torch module), packed once
# into the single weight/bias slab consumed by the fused kernel.
# ---------------------------------------------------------------------------
def init_params(key):
    keys = iter(jax.random.split(key, 64))

    def p(shape, scale=0.2):
        return (scale * jax.random.normal(next(keys), shape)).astype(jnp.float32)

    H, F = HIDDEN, NUM_STATE_FEATURES

    conv10_w = p((NUM_HOPS_1 + 1, GAME_FEAT, H)); conv10_b = p((H,))
    conv1_w = p((NUM_RELATIONS, H, H)); conv1_root = p((H, H)); conv1_b = p((H,))
    conv3_wk_x = p((GAME_FEAT, H)); conv3_wk_e = p((EDGE_ATTR_DIM, H)); conv3_bk = p((H,))
    conv3_wq_x = p((H, H)); conv3_wq_e = p((EDGE_ATTR_DIM, H)); conv3_bq = p((H,))
    conv3_wv_x = p((H, H)); conv3_wv_e = p((EDGE_ATTR_DIM, H)); conv3_bv = p((H,))
    conv3_wskip = p((GAME_FEAT, H)); conv3_b = p((H,))
    conv32_wl = p((H, H)); conv32_bl = p((H,)); conv32_wr = p((H, H))
    conv4_wl = p((H, H)); conv4_bl = p((H,)); conv4_wr = p((H, H))
    conv42_wl = p((H, H)); conv42_bl = p((H,)); conv42_wr = p((H, H))
    conv2_w = p((NUM_HOPS_2 + 1, H, H)); conv2_b = p((H,))
    conv5_wl = p((H, H)); conv5_bl = p((H,)); conv5_wr = p((H, H))
    lin_w = p((H, F)); lin_b = p((F,))
    lin_last_w = p((F, 1)); lin_last_b = p((1,))

    biases = jnp.stack([
        conv10_b, conv1_b, conv3_bk, conv3_bq, conv3_bv, conv3_b,
        conv32_bl, conv4_bl, conv42_bl, conv2_b, conv5_bl,
        jnp.pad(lin_b, (0, H - F)), jnp.pad(lin_last_b, (0, H - 1)),
    ])                                                             # (13, H)

    blocks = {
        "tag10_0": conv10_w[0], "tag10_1": conv10_w[1], "tag10_2": conv10_w[2],
        "rgcn_0": conv1_w[0], "rgcn_1": conv1_w[1], "rgcn_2": conv1_w[2],
        "rgcn_root": conv1_root,
        "k_x": conv3_wk_x, "skip": conv3_wskip, "q_x": conv3_wq_x, "v_x": conv3_wv_x,
        "k_e": conv3_wk_e, "q_e": conv3_wq_e, "v_e": conv3_wv_e,
        "sage32_l": conv32_wl, "sage32_r": conv32_wr,
        "sage4_l": conv4_wl, "sage4_r": conv4_wr,
        "sage42_l": conv42_wl, "sage42_r": conv42_wr,
        "tag2_0": conv2_w[0], "tag2_1": conv2_w[1], "tag2_2": conv2_w[2],
        "tag2_3": conv2_w[3],
        "sage5_l": conv5_wl, "sage5_r": conv5_wr,
        "lin": lin_w, "last_t": lin_last_w.T, "bias": biases,
    }

    slab = jnp.zeros((_W_ROWS, H), jnp.float32)
    for name, rows, cols in _W_BLOCKS:
        o = _W_OFFS[name]
        slab = slab.at[o:o + rows, :cols].set(blocks[name])
    return {"w": slab}


# ---------------------------------------------------------------------------
# Forward: pack operands (one-time, cheap XLA glue), then ONE fused pallas_call.
# ---------------------------------------------------------------------------
def state_model_encoder_forward(params, game_x, state_x, edge_index_v_v, edge_type_v_v,
                                edge_index_history_v_s, edge_attr_history_v_s,
                                edge_index_in_v_s, edge_index_s_s):
    ng, ns = game_x.shape[0], state_x.shape[0]
    e_vv = edge_index_v_v.shape[1]
    e_h = edge_index_history_v_s.shape[1]
    e_in = edge_index_in_v_s.shape[1]
    e_ss = edge_index_s_s.shape[1]

    # ---- pack node features + edge attributes into one f32 slab (3 DMAs -> 1)
    def pad8(a, cols):
        a = a.astype(jnp.float32)
        return jnp.pad(a, ((0, (-a.shape[0]) % 8), (0, cols - a.shape[1])))

    g_blk = pad8(game_x, 8)
    s_blk = pad8(state_x, 8)
    e_blk = pad8(edge_attr_history_v_s, 8)
    d_offs = (0, g_blk.shape[0], g_blk.shape[0] + s_blk.shape[0])
    data = jnp.concatenate([g_blk, s_blk, e_blk], axis=0)

    # ---- pack the 9 edge-index vectors into 2 int32 operands (9 DMAs -> 2)
    e_max = max(e_vv, e_h, e_in, e_ss)

    def col(v):
        v = v.astype(jnp.int32)
        return jnp.pad(v, (0, e_max - v.shape[0]), constant_values=-1)[:, None]

    def row(v):
        v = v.astype(jnp.int32)
        return jnp.pad(v, (0, e_max - v.shape[0]), constant_values=-1)[None, :]

    idx_col = jnp.concatenate([
        col(edge_index_v_v[0]), col(edge_type_v_v),
        col(edge_index_history_v_s[0]), col(edge_index_history_v_s[1]),
        col(edge_index_in_v_s[0]), col(edge_index_s_s[0])], axis=1)     # (Emax, 6)
    idx_row = jnp.concatenate([
        row(edge_index_v_v[1]), row(edge_index_history_v_s[1]),
        row(edge_index_in_v_s[1]), row(edge_index_s_s[1])], axis=0)     # (4, Emax)

    kernel = _make_kernel(ng, ns, e_vv, e_h, e_in, e_ss, d_offs)
    vmem = pl.BlockSpec(memory_space=pltpu.MemorySpace.VMEM)
    out_row = pl.pallas_call(
        kernel,
        out_shape=jax.ShapeDtypeStruct((1, ns), jnp.float32),
        in_specs=[vmem, vmem, vmem, vmem],
        out_specs=vmem,
        compiler_params=pltpu.CompilerParams(vmem_limit_bytes=32 * 1024 * 1024),
    )(data, idx_col, idx_row, params["w"])

    # Kernel emits lane-dense (1, n_state) logits; restore the module's (n_state, 1).
    return out_row.reshape(ns, 1)


# ---------------------------------------------------------------------------
# Example run
# ---------------------------------------------------------------------------
if __name__ == "__main__":
    key = jax.random.PRNGKey(0)
    (k_param, k_gx, k_sx, k_e1, k_e2, k_t, k_h1, k_h2, k_ea, k_i1, k_i2,
     k_s1, k_s2) = jax.random.split(key, 13)

    n_game, n_state = 16, 8
    e_vv, e_hist, e_in, e_ss = 24, 12, 10, 12

    params = init_params(k_param)

    game_x = jax.random.normal(k_gx, (n_game, GAME_FEAT), jnp.float32)
    state_x = jax.random.normal(k_sx, (n_state, GAME_FEAT), jnp.float32)

    edge_index_v_v = jnp.stack([
        jax.random.randint(k_e1, (e_vv,), 0, n_game),
        jax.random.randint(k_e2, (e_vv,), 0, n_game)])
    edge_type_v_v = jax.random.randint(k_t, (e_vv,), 0, NUM_RELATIONS)

    edge_index_history_v_s = jnp.stack([
        jax.random.randint(k_h1, (e_hist,), 0, n_game),
        jax.random.randint(k_h2, (e_hist,), 0, n_state)])
    edge_attr_history_v_s = jax.random.normal(k_ea, (e_hist, EDGE_ATTR_DIM), jnp.float32)

    edge_index_in_v_s = jnp.stack([
        jax.random.randint(k_i1, (e_in,), 0, n_game),
        jax.random.randint(k_i2, (e_in,), 0, n_state)])

    edge_index_s_s = jnp.stack([
        jax.random.randint(k_s1, (e_ss,), 0, n_state),
        jax.random.randint(k_s2, (e_ss,), 0, n_state)])

    forward = jax.jit(state_model_encoder_forward)
    out = forward(params, game_x, state_x, edge_index_v_v, edge_type_v_v,
                  edge_index_history_v_s, edge_attr_history_v_s,
                  edge_index_in_v_s, edge_index_s_s)
    out = jax.block_until_ready(out)

    assert out.shape == (n_state, 1), out.shape
    assert bool(jnp.isfinite(out).all())
    # log_softmax over dim 0: probabilities should sum to 1.
    assert abs(float(jnp.sum(jnp.exp(out[:, 0]))) - 1.0) < 1e-3
    print("KERNEL_OK")
</pallas_src>

<mosaic_0001>
module attributes {stable_mosaic.version = 11 : i64} {
  func.func @kernel(%arg0: memref<40x8xf32, #tpu.memory_space<vmem>>, %arg1: memref<24x6xi32, #tpu.memory_space<vmem>>, %arg2: memref<4x24xi32, #tpu.memory_space<vmem>>, %arg3: memref<696x32xf32, #tpu.memory_space<vmem>>, %arg4: memref<1x8xf32, #tpu.memory_space<vmem>>) attributes {dimension_semantics = [], scalar_prefetch = 0 : i64, scratch_operands = 0 : i64, tpu.core_type = #tpu.core_type<tc>} {
    %c680 = arith.constant 680 : index
    %c0 = arith.constant 0 : index
    %0 = vector.load %arg3[%c680, %c0] : memref<696x32xf32, #tpu.memory_space<vmem>>, vector<13x32xf32>
    %c0_0 = arith.constant 0 : index
    %c0_1 = arith.constant 0 : index
    %1 = vector.load %arg0[%c0_0, %c0_1] : memref<40x8xf32, #tpu.memory_space<vmem>>, vector<16x7xf32>
    %c16 = arith.constant 16 : index
    %c0_2 = arith.constant 0 : index
    %2 = vector.load %arg0[%c16, %c0_2] : memref<40x8xf32, #tpu.memory_space<vmem>>, vector<8x7xf32>
    %c24 = arith.constant 24 : index
    %c0_3 = arith.constant 0 : index
    %3 = vector.load %arg0[%c24, %c0_3] : memref<40x8xf32, #tpu.memory_space<vmem>>, vector<12x2xf32>
    %c0_4 = arith.constant 0 : index
    %c0_5 = arith.constant 0 : index
    %4 = vector.load %arg1[%c0_4, %c0_5] : memref<24x6xi32, #tpu.memory_space<vmem>>, vector<24x1xi32>
    %c0_6 = arith.constant 0 : index
    %c1 = arith.constant 1 : index
    %5 = vector.load %arg1[%c0_6, %c1] : memref<24x6xi32, #tpu.memory_space<vmem>>, vector<24x1xi32>
    %c0_7 = arith.constant 0 : index
    %c2 = arith.constant 2 : index
    %6 = vector.load %arg1[%c0_7, %c2] : memref<24x6xi32, #tpu.memory_space<vmem>>, vector<12x1xi32>
    %c0_8 = arith.constant 0 : index
    %c3 = arith.constant 3 : index
    %7 = vector.load %arg1[%c0_8, %c3] : memref<24x6xi32, #tpu.memory_space<vmem>>, vector<12x1xi32>
    %c0_9 = arith.constant 0 : index
    %c4 = arith.constant 4 : index
    %8 = vector.load %arg1[%c0_9, %c4] : memref<24x6xi32, #tpu.memory_space<vmem>>, vector<10x1xi32>
    %c0_10 = arith.constant 0 : index
    %c5 = arith.constant 5 : index
    %9 = vector.load %arg1[%c0_10, %c5] : memref<24x6xi32, #tpu.memory_space<vmem>>, vector<12x1xi32>
    %c0_11 = arith.constant 0 : index
    %c0_12 = arith.constant 0 : index
    %10 = vector.load %arg2[%c0_11, %c0_12] : memref<4x24xi32, #tpu.memory_space<vmem>>, vector<1x24xi32>
    %c1_13 = arith.constant 1 : index
    %c0_14 = arith.constant 0 : index
    %11 = vector.load %arg2[%c1_13, %c0_14] : memref<4x24xi32, #tpu.memory_space<vmem>>, vector<1x12xi32>
    %c2_15 = arith.constant 2 : index
    %c0_16 = arith.constant 0 : index
    %12 = vector.load %arg2[%c2_15, %c0_16] : memref<4x24xi32, #tpu.memory_space<vmem>>, vector<1x10xi32>
    %c3_17 = arith.constant 3 : index
    %c0_18 = arith.constant 0 : index
    %13 = vector.load %arg2[%c3_17, %c0_18] : memref<4x24xi32, #tpu.memory_space<vmem>>, vector<1x12xi32>
    %14 = tpu.iota {dimensions = array<i32: 1>} : vector<24x16xi32>
    %15 = vector.broadcast %4 : vector<24x1xi32> to vector<24x16xi32>
    %16 = arith.cmpi eq, %14, %15 : vector<24x16xi32>
    %17 = arith.extui %16 : vector<24x16xi1> to vector<24x16xi32>
    %18 = arith.sitofp %17 : vector<24x16xi32> to vector<24x16xf32>
    %19 = arith.truncf %18 : vector<24x16xf32> to vector<24x16xbf16>
    %20 = tpu.iota {dimensions = array<i32: 0>} : vector<16x24xi32>
    %21 = vector.broadcast %10 : vector<1x24xi32> to vector<16x24xi32>
    %22 = arith.cmpi eq, %20, %21 : vector<16x24xi32>
    %23 = arith.extui %22 : vector<16x24xi1> to vector<16x24xi32>
    %24 = arith.sitofp %23 : vector<16x24xi32> to vector<16x24xf32>
    %25 = arith.truncf %24 : vector<16x24xf32> to vector<16x24xbf16>
    %26 = tpu.iota {dimensions = array<i32: 1>} : vector<12x16xi32>
    %27 = vector.broadcast %6 : vector<12x1xi32> to vector<12x16xi32>
    %28 = arith.cmpi eq, %26, %27 : vector<12x16xi32>
    %29 = arith.extui %28 : vector<12x16xi1> to vector<12x16xi32>
    %30 = arith.sitofp %29 : vector<12x16xi32> to vector<12x16xf32>
    %31 = arith.truncf %30 : vector<12x16xf32> to vector<12x16xbf16>
    %32 = tpu.iota {dimensions = array<i32: 1>} : vector<12x8xi32>
    %33 = vector.broadcast %7 : vector<12x1xi32> to vector<12x8xi32>
    %34 = arith.cmpi eq, %32, %33 : vector<12x8xi32>
    %35 = arith.extui %34 : vector<12x8xi1> to vector<12x8xi32>
    %36 = arith.sitofp %35 : vector<12x8xi32> to vector<12x8xf32>
    %37 = arith.truncf %36 : vector<12x8xf32> to vector<12x8xbf16>
    %38 = tpu.iota {dimensions = array<i32: 0>} : vector<8x12xi32>
    %39 = vector.broadcast %11 : vector<1x12xi32> to vector<8x12xi32>
    %40 = arith.cmpi eq, %38, %39 : vector<8x12xi32>
    %41 = arith.extui %40 : vector<8x12xi1> to vector<8x12xi32>
    %42 = arith.sitofp %41 : vector<8x12xi32> to vector<8x12xf32>
    %43 = tpu.iota {dimensions = array<i32: 1>} : vector<10x16xi32>
    %44 = vector.broadcast %8 : vector<10x1xi32> to vector<10x16xi32>
    %45 = arith.cmpi eq, %43, %44 : vector<10x16xi32>
    %46 = arith.extui %45 : vector<10x16xi1> to vector<10x16xi32>
    %47 = arith.sitofp %46 : vector<10x16xi32> to vector<10x16xf32>
    %48 = arith.truncf %47 : vector<10x16xf32> to vector<10x16xbf16>
    %49 = tpu.iota {dimensions = array<i32: 0>} : vector<8x10xi32>
    %50 = vector.broadcast %12 : vector<1x10xi32> to vector<8x10xi32>
    %51 = arith.cmpi eq, %49, %50 : vector<8x10xi32>
    %52 = arith.extui %51 : vector<8x10xi1> to vector<8x10xi32>
    %53 = arith.sitofp %52 : vector<8x10xi32> to vector<8x10xf32>
    %54 = tpu.iota {dimensions = array<i32: 1>} : vector<12x8xi32>
    %55 = vector.broadcast %9 : vector<12x1xi32> to vector<12x8xi32>
    %56 = arith.cmpi eq, %54, %55 : vector<12x8xi32>
    %57 = arith.extui %56 : vector<12x8xi1> to vector<12x8xi32>
    %58 = arith.sitofp %57 : vector<12x8xi32> to vector<12x8xf32>
    %59 = arith.truncf %58 : vector<12x8xf32> to vector<12x8xbf16>
    %60 = tpu.iota {dimensions = array<i32: 0>} : vector<8x12xi32>
    %61 = vector.broadcast %13 : vector<1x12xi32> to vector<8x12xi32>
    %62 = arith.cmpi eq, %60, %61 : vector<8x12xi32>
    %63 = arith.extui %62 : vector<8x12xi1> to vector<8x12xi32>
    %64 = arith.sitofp %63 : vector<8x12xi32> to vector<8x12xf32>
    %cst = arith.constant dense<0.000000e+00> : vector<8xf32>
    %65 = vector.multi_reduction <add>, %42, %cst [1] : vector<8x12xf32> to vector<8xf32>
    %66 = vector.shape_cast %65 : vector<8xf32> to vector<8x1xf32>
    %cst_19 = arith.constant 1.000000e+00 : f32
    %67 = vector.broadcast %cst_19 : f32 to vector<8x1xf32>
    %68 = arith.maximumf %66, %67 : vector<8x1xf32>
    %69 = tpu.reciprocal %68 {approx = true} : vector<8x1xf32> -> vector<8x1xf32>
    %cst_20 = arith.constant dense<0.000000e+00> : vector<8xf32>
    %70 = vector.multi_reduction <add>, %53, %cst_20 [1] : vector<8x10xf32> to vector<8xf32>
    %71 = vector.shape_cast %70 : vector<8xf32> to vector<8x1xf32>
    %cst_21 = arith.constant 1.000000e+00 : f32
    %72 = vector.broadcast %cst_21 : f32 to vector<8x1xf32>
    %73 = arith.maximumf %71, %72 : vector<8x1xf32>
    %74 = tpu.reciprocal %73 {approx = true} : vector<8x1xf32> -> vector<8x1xf32>
    %cst_22 = arith.constant dense<0.000000e+00> : vector<8xf32>
    %75 = vector.multi_reduction <add>, %64, %cst_22 [1] : vector<8x12xf32> to vector<8xf32>
    %76 = vector.shape_cast %75 : vector<8xf32> to vector<8x1xf32>
    %cst_23 = arith.constant 1.000000e+00 : f32
    %77 = vector.broadcast %cst_23 : f32 to vector<8x1xf32>
    %78 = arith.maximumf %76, %77 : vector<8x1xf32>
    %79 = tpu.reciprocal %78 {approx = true} : vector<8x1xf32> -> vector<8x1xf32>
    %80 = arith.truncf %42 : vector<8x12xf32> to vector<8x12xbf16>
    %81 = arith.truncf %53 : vector<8x10xf32> to vector<8x10xbf16>
    %82 = arith.truncf %64 : vector<8x12xf32> to vector<8x12xbf16>
    %c0_24 = arith.constant 0 : index
    %c0_25 = arith.constant 0 : index
    %83 = vector.load %arg3[%c0_24, %c0_25] : memref<696x32xf32, #tpu.memory_space<vmem>>, vector<7x32xf32>
    %cst_26 = arith.constant dense<0.000000e+00> : vector<16x32xf32>
    %84 = tpu.matmul %1, %83, %cst_26 {dimension_numbers = #tpu.dot_dimension_numbers<[1], [0], [0], [1], [0, 0, 1, 1], [], []>} : vector<16x7xf32>, vector<7x32xf32>, vector<16x32xf32> -> vector<16x32xf32>
    %85 = vector.extract_strided_slice %0 {offsets = [0, 0], sizes = [1, 32], strides = [1, 1]} : vector<13x32xf32> to vector<1x32xf32>
    %86 = vector.broadcast %85 : vector<1x32xf32> to vector<16x32xf32>
    %87 = arith.addf %84, %86 : vector<16x32xf32>
    %88 = arith.truncf %1 : vector<16x7xf32> to vector<16x7xbf16>
    %cst_27 = arith.constant dense<0.000000e+00> : vector<24x7xf32>
    %89 = tpu.matmul %19, %88, %cst_27 {dimension_numbers = #tpu.dot_dimension_numbers<[1], [0], [0], [1], [0, 0, 1, 1], [], []>} : vector<24x16xbf16>, vector<16x7xbf16>, vector<24x7xf32> -> vector<24x7xf32>
    %90 = arith.truncf %89 : vector<24x7xf32> to vector<24x7xbf16>
    %cst_28 = arith.constant dense<0.000000e+00> : vector<16x7xf32>
    %91 = tpu.matmul %25, %90, %cst_28 {dimension_numbers = #tpu.dot_dimension_numbers<[1], [0], [0], [1], [0, 0, 1, 1], [], []>} : vector<16x24xbf16>, vector<24x7xbf16>, vector<16x7xf32> -> vector<16x7xf32>
    %c8 = arith.constant 8 : index
    %c0_29 = arith.constant 0 : index
    %92 = vector.load %arg3[%c8, %c0_29] : memref<696x32xf32, #tpu.memory_space<vmem>>, vector<7x32xf32>
    %cst_30 = arith.constant dense<0.000000e+00> : vector<16x32xf32>
    %93 = tpu.matmul %91, %92, %cst_30 {dimension_numbers = #tpu.dot_dimension_numbers<[1], [0], [0], [1], [0, 0, 1, 1], [], []>} : vector<16x7xf32>, vector<7x32xf32>, vector<16x32xf32> -> vector<16x32xf32>
    %94 = arith.addf %87, %93 : vector<16x32xf32>
    %95 = arith.truncf %91 : vector<16x7xf32> to vector<16x7xbf16>
    %cst_31 = arith.constant dense<0.000000e+00> : vector<24x7xf32>
    %96 = tpu.matmul %19, %95, %cst_31 {dimension_numbers = #tpu.dot_dimension_numbers<[1], [0], [0], [1], [0, 0, 1, 1], [], []>} : vector<24x16xbf16>, vector<16x7xbf16>, vector<24x7xf32> -> vector<24x7xf32>
    %97 = arith.truncf %96 : vector<24x7xf32> to vector<24x7xbf16>
    %cst_32 = arith.constant dense<0.000000e+00> : vector<16x7xf32>
    %98 = tpu.matmul %25, %97, %cst_32 {dimension_numbers = #tpu.dot_dimension_numbers<[1], [0], [0], [1], [0, 0, 1, 1], [], []>} : vector<16x24xbf16>, vector<24x7xbf16>, vector<16x7xf32> -> vector<16x7xf32>
    %c16_33 = arith.constant 16 : index
    %c0_34 = arith.constant 0 : index
    %99 = vector.load %arg3[%c16_33, %c0_34] : memref<696x32xf32, #tpu.memory_space<vmem>>, vector<7x32xf32>
    %cst_35 = arith.constant dense<0.000000e+00> : vector<16x32xf32>
    %100 = tpu.matmul %98, %99, %cst_35 {dimension_numbers = #tpu.dot_dimension_numbers<[1], [0], [0], [1], [0, 0, 1, 1], [], []>} : vector<16x7xf32>, vector<7x32xf32>, vector<16x32xf32> -> vector<16x32xf32>
    %101 = arith.addf %94, %100 : vector<16x32xf32>
    %cst_36 = arith.constant 0.000000e+00 : f32
    %102 = vector.broadcast %cst_36 : f32 to vector<16x32xf32>
    %103 = arith.maximumf %101, %102 : vector<16x32xf32>
    %104 = arith.truncf %103 : vector<16x32xf32> to vector<16x32xbf16>
    %cst_37 = arith.constant dense<0.000000e+00> : vector<24x32xf32>
    %105 = tpu.matmul %19, %104, %cst_37 {dimension_numbers = #tpu.dot_dimension_numbers<[1], [0], [0], [1], [0, 0, 1, 1], [], []>} : vector<24x16xbf16>, vector<16x32xbf16>, vector<24x32xf32> -> vector<24x32xf32>
    %106 = tpu.iota {dimensions = array<i32: 1>} : vector<24x3xi32>
    %107 = vector.broadcast %5 : vector<24x1xi32> to vector<24x3xi32>
    %108 = arith.cmpi eq, %106, %107 : vector<24x3xi32>
    %109 = arith.extui %108 : vector<24x3xi1> to vector<24x3xi32>
    %110 = arith.sitofp %109 : vector<24x3xi32> to vector<24x3xf32>
    %111 = arith.truncf %110 : vector<24x3xf32> to vector<24x3xbf16>
    %cst_38 = arith.constant dense<0.000000e+00> : vector<16x3xf32>
    %112 = tpu.matmul %25, %111, %cst_38 {dimension_numbers = #tpu.dot_dimension_numbers<[1], [0], [0], [1], [0, 0, 1, 1], [], []>} : vector<16x24xbf16>, vector<24x3xbf16>, vector<16x3xf32> -> vector<16x3xf32>
    %c120 = arith.constant 120 : index
    %c0_39 = arith.constant 0 : index
    %113 = vector.load %arg3[%c120, %c0_39] : memref<696x32xf32, #tpu.memory_space<vmem>>, vector<32x32xf32>
    %cst_40 = arith.constant dense<0.000000e+00> : vector<16x32xf32>
    %114 = tpu.matmul %103, %113, %cst_40 {dimension_numbers = #tpu.dot_dimension_numbers<[1], [0], [0], [1], [0, 0, 1, 1], [], []>} : vector<16x32xf32>, vector<32x32xf32>, vector<16x32xf32> -> vector<16x32xf32>
    %115 = vector.extract_strided_slice %0 {offsets = [1, 0], sizes = [1, 32], strides = [1, 1]} : vector<13x32xf32> to vector<1x32xf32>
    %116 = vector.broadcast %115 : vector<1x32xf32> to vector<16x32xf32>
    %117 = arith.addf %114, %116 : vector<16x32xf32>
    %c0_i32 = arith.constant 0 : i32
    %118 = vector.broadcast %c0_i32 : i32 to vector<24x1xi32>
    %119 = arith.cmpi eq, %5, %118 : vector<24x1xi32>
    %120 = arith.extui %119 : vector<24x1xi1> to vector<24x1xi32>
    %121 = arith.sitofp %120 : vector<24x1xi32> to vector<24x1xf32>
    %122 = vector.broadcast %121 : vector<24x1xf32> to vector<24x32xf32>
    %123 = arith.mulf %105, %122 : vector<24x32xf32>
    %124 = arith.truncf %123 : vector<24x32xf32> to vector<24x32xbf16>
    %cst_41 = arith.constant dense<0.000000e+00> : vector<16x32xf32>
    %125 = tpu.matmul %25, %124, %cst_41 {dimension_numbers = #tpu.dot_dimension_numbers<[1], [0], [0], [1], [0, 0, 1, 1], [], []>} : vector<16x24xbf16>, vector<24x32xbf16>, vector<16x32xf32> -> vector<16x32xf32>
    %126 = vector.extract_strided_slice %112 {offsets = [0, 0], sizes = [16, 1], strides = [1, 1]} : vector<16x3xf32> to vector<16x1xf32>
    %cst_42 = arith.constant 1.000000e+00 : f32
    %127 = vector.broadcast %cst_42 : f32 to vector<16x1xf32>
    %128 = arith.maximumf %126, %127 : vector<16x1xf32>
    %129 = tpu.reciprocal %128 {approx = true} : vector<16x1xf32> -> vector<16x1xf32>
    %130 = vector.broadcast %129 : vector<16x1xf32> to vector<16x32xf32>
    %131 = arith.mulf %125, %130 : vector<16x32xf32>
    %c24_43 = arith.constant 24 : index
    %c0_44 = arith.constant 0 : index
    %132 = vector.load %arg3[%c24_43, %c0_44] : memref<696x32xf32, #tpu.memory_space<vmem>>, vector<32x32xf32>
    %cst_45 = arith.constant dense<0.000000e+00> : vector<16x32xf32>
    %133 = tpu.matmul %131, %132, %cst_45 {dimension_numbers = #tpu.dot_dimension_numbers<[1], [0], [0], [1], [0, 0, 1, 1], [], []>} : vector<16x32xf32>, vector<32x32xf32>, vector<16x32xf32> -> vector<16x32xf32>
    %134 = arith.addf %117, %133 : vector<16x32xf32>
    %c1_i32 = arith.constant 1 : i32
    %135 = vector.broadcast %c1_i32 : i32 to vector<24x1xi32>
    %136 = arith.cmpi eq, %5, %135 : vector<24x1xi32>
    %137 = arith.extui %136 : vector<24x1xi1> to vector<24x1xi32>
    %138 = arith.sitofp %137 : vector<24x1xi32> to vector<24x1xf32>
    %139 = vector.broadcast %138 : vector<24x1xf32> to vector<24x32xf32>
    %140 = arith.mulf %105, %139 : vector<24x32xf32>
    %141 = arith.truncf %140 : vector<24x32xf32> to vector<24x32xbf16>
    %cst_46 = arith.constant dense<0.000000e+00> : vector<16x32xf32>
    %142 = tpu.matmul %25, %141, %cst_46 {dimension_numbers = #tpu.dot_dimension_numbers<[1], [0], [0], [1], [0, 0, 1, 1], [], []>} : vector<16x24xbf16>, vector<24x32xbf16>, vector<16x32xf32> -> vector<16x32xf32>
    %143 = vector.extract_strided_slice %112 {offsets = [0, 1], sizes = [16, 1], strides = [1, 1]} : vector<16x3xf32> to vector<16x1xf32>
    %cst_47 = arith.constant 1.000000e+00 : f32
    %144 = vector.broadcast %cst_47 : f32 to vector<16x1xf32>
    %145 = arith.maximumf %143, %144 : vector<16x1xf32>
    %146 = tpu.reciprocal %145 {approx = true} : vector<16x1xf32> -> vector<16x1xf32>
    %147 = vector.broadcast %146 : vector<16x1xf32> to vector<16x32xf32>
    %148 = arith.mulf %142, %147 : vector<16x32xf32>
    %c56 = arith.constant 56 : index
    %c0_48 = arith.constant 0 : index
    %149 = vector.load %arg3[%c56, %c0_48] : memref<696x32xf32, #tpu.memory_space<vmem>>, vector<32x32xf32>
    %cst_49 = arith.constant dense<0.000000e+00> : vector<16x32xf32>
    %150 = tpu.matmul %148, %149, %cst_49 {dimension_numbers = #tpu.dot_dimension_numbers<[1], [0], [0], [1], [0, 0, 1, 1], [], []>} : vector<16x32xf32>, vector<32x32xf32>, vector<16x32xf32> -> vector<16x32xf32>
    %151 = arith.addf %134, %150 : vector<16x32xf32>
    %c2_i32 = arith.constant 2 : i32
    %152 = vector.broadcast %c2_i32 : i32 to vector<24x1xi32>
    %153 = arith.cmpi eq, %5, %152 : vector<24x1xi32>
    %154 = arith.extui %153 : vector<24x1xi1> to vector<24x1xi32>
    %155 = arith.sitofp %154 : vector<24x1xi32> to vector<24x1xf32>
    %156 = vector.broadcast %155 : vector<24x1xf32> to vector<24x32xf32>
    %157 = arith.mulf %105, %156 : vector<24x32xf32>
    %158 = arith.truncf %157 : vector<24x32xf32> to vector<24x32xbf16>
    %cst_50 = arith.constant dense<0.000000e+00> : vector<16x32xf32>
    %159 = tpu.matmul %25, %158, %cst_50 {dimension_numbers = #tpu.dot_dimension_numbers<[1], [0], [0], [1], [0, 0, 1, 1], [], []>} : vector<16x24xbf16>, vector<24x32xbf16>, vector<16x32xf32> -> vector<16x32xf32>
    %160 = vector.extract_strided_slice %112 {offsets = [0, 2], sizes = [16, 1], strides = [1, 1]} : vector<16x3xf32> to vector<16x1xf32>
    %cst_51 = arith.constant 1.000000e+00 : f32
    %161 = vector.broadcast %cst_51 : f32 to vector<16x1xf32>
    %162 = arith.maximumf %160, %161 : vector<16x1xf32>
    %163 = tpu.reciprocal %162 {approx = true} : vector<16x1xf32> -> vector<16x1xf32>
    %164 = vector.broadcast %163 : vector<16x1xf32> to vector<16x32xf32>
    %165 = arith.mulf %159, %164 : vector<16x32xf32>
    %c88 = arith.constant 88 : index
    %c0_52 = arith.constant 0 : index
    %166 = vector.load %arg3[%c88, %c0_52] : memref<696x32xf32, #tpu.memory_space<vmem>>, vector<32x32xf32>
    %cst_53 = arith.constant dense<0.000000e+00> : vector<16x32xf32>
    %167 = tpu.matmul %165, %166, %cst_53 {dimension_numbers = #tpu.dot_dimension_numbers<[1], [0], [0], [1], [0, 0, 1, 1], [], []>} : vector<16x32xf32>, vector<32x32xf32>, vector<16x32xf32> -> vector<16x32xf32>
    %168 = arith.addf %151, %167 : vector<16x32xf32>
    %cst_54 = arith.constant 0.000000e+00 : f32
    %169 = vector.broadcast %cst_54 : f32 to vector<16x32xf32>
    %170 = arith.maximumf %168, %169 : vector<16x32xf32>
    %171 = arith.truncf %170 : vector<16x32xf32> to vector<16x32xbf16>
    %cst_55 = arith.constant dense<0.000000e+00> : vector<12x32xf32>
    %172 = tpu.matmul %31, %171, %cst_55 {dimension_numbers = #tpu.dot_dimension_numbers<[1], [0], [0], [1], [0, 0, 1, 1], [], []>} : vector<12x16xbf16>, vector<16x32xbf16>, vector<12x32xf32> -> vector<12x32xf32>
    %c152 = arith.constant 152 : index
    %c0_56 = arith.constant 0 : index
    %173 = vector.load %arg3[%c152, %c0_56] : memref<696x32xf32, #tpu.memory_space<vmem>>, vector<7x32xf32>
    %cst_57 = arith.constant dense<0.000000e+00> : vector<8x32xf32>
    %174 = tpu.matmul %2, %173, %cst_57 {dimension_numbers = #tpu.dot_dimension_numbers<[1], [0], [0], [1], [0, 0, 1, 1], [], []>} : vector<8x7xf32>, vector<7x32xf32>, vector<8x32xf32> -> vector<8x32xf32>
    %c160 = arith.constant 160 : index
    %c0_58 = arith.constant 0 : index
    %175 = vector.load %arg3[%c160, %c0_58] : memref<696x32xf32, #tpu.memory_space<vmem>>, vector<7x32xf32>
    %cst_59 = arith.constant dense<0.000000e+00> : vector<8x32xf32>
    %176 = tpu.matmul %2, %175, %cst_59 {dimension_numbers = #tpu.dot_dimension_numbers<[1], [0], [0], [1], [0, 0, 1, 1], [], []>} : vector<8x7xf32>, vector<7x32xf32>, vector<8x32xf32> -> vector<8x32xf32>
    %177 = arith.truncf %174 : vector<8x32xf32> to vector<8x32xbf16>
    %cst_60 = arith.constant dense<0.000000e+00> : vector<12x32xf32>
    %178 = tpu.matmul %37, %177, %cst_60 {dimension_numbers = #tpu.dot_dimension_numbers<[1], [0], [0], [1], [0, 0, 1, 1], [], []>} : vector<12x8xbf16>, vector<8x32xbf16>, vector<12x32xf32> -> vector<12x32xf32>
    %c232 = arith.constant 232 : index
    %c0_61 = arith.constant 0 : index
    %179 = vector.load %arg3[%c232, %c0_61] : memref<696x32xf32, #tpu.memory_space<vmem>>, vector<2x32xf32>
    %cst_62 = arith.constant dense<0.000000e+00> : vector<12x32xf32>
    %180 = tpu.matmul %3, %179, %cst_62 {dimension_numbers = #tpu.dot_dimension_numbers<[1], [0], [0], [1], [0, 0, 1, 1], [], []>} : vector<12x2xf32>, vector<2x32xf32>, vector<12x32xf32> -> vector<12x32xf32>
    %181 = arith.addf %178, %180 : vector<12x32xf32>
    %182 = vector.extract_strided_slice %0 {offsets = [2, 0], sizes = [1, 32], strides = [1, 1]} : vector<13x32xf32> to vector<1x32xf32>
    %183 = vector.broadcast %182 : vector<1x32xf32> to vector<12x32xf32>
    %184 = arith.addf %181, %183 : vector<12x32xf32>
    %c168 = arith.constant 168 : index
    %c0_63 = arith.constant 0 : index
    %185 = vector.load %arg3[%c168, %c0_63] : memref<696x32xf32, #tpu.memory_space<vmem>>, vector<32x32xf32>
    %cst_64 = arith.constant dense<0.000000e+00> : vector<12x32xf32>
    %186 = tpu.matmul %172, %185, %cst_64 {dimension_numbers = #tpu.dot_dimension_numbers<[1], [0], [0], [1], [0, 0, 1, 1], [], []>} : vector<12x32xf32>, vector<32x32xf32>, vector<12x32xf32> -> vector<12x32xf32>
    %c240 = arith.constant 240 : index
    %c0_65 = arith.constant 0 : index
    %187 = vector.load %arg3[%c240, %c0_65] : memref<696x32xf32, #tpu.memory_space<vmem>>, vector<2x32xf32>
    %cst_66 = arith.constant dense<0.000000e+00> : vector<12x32xf32>
    %188 = tpu.matmul %3, %187, %cst_66 {dimension_numbers = #tpu.dot_dimension_numbers<[1], [0], [0], [1], [0, 0, 1, 1], [], []>} : vector<12x2xf32>, vector<2x32xf32>, vector<12x32xf32> -> vector<12x32xf32>
    %189 = arith.addf %186, %188 : vector<12x32xf32>
    %190 = vector.extract_strided_slice %0 {offsets = [3, 0], sizes = [1, 32], strides = [1, 1]} : vector<13x32xf32> to vector<1x32xf32>
    %191 = vector.broadcast %190 : vector<1x32xf32> to vector<12x32xf32>
    %192 = arith.addf %189, %191 : vector<12x32xf32>
    %c200 = arith.constant 200 : index
    %c0_67 = arith.constant 0 : index
    %193 = vector.load %arg3[%c200, %c0_67] : memref<696x32xf32, #tpu.memory_space<vmem>>, vector<32x32xf32>
    %cst_68 = arith.constant dense<0.000000e+00> : vector<12x32xf32>
    %194 = tpu.matmul %172, %193, %cst_68 {dimension_numbers = #tpu.dot_dimension_numbers<[1], [0], [0], [1], [0, 0, 1, 1], [], []>} : vector<12x32xf32>, vector<32x32xf32>, vector<12x32xf32> -> vector<12x32xf32>
    %c248 = arith.constant 248 : index
    %c0_69 = arith.constant 0 : index
    %195 = vector.load %arg3[%c248, %c0_69] : memref<696x32xf32, #tpu.memory_space<vmem>>, vector<2x32xf32>
    %cst_70 = arith.constant dense<0.000000e+00> : vector<12x32xf32>
    %196 = tpu.matmul %3, %195, %cst_70 {dimension_numbers = #tpu.dot_dimension_numbers<[1], [0], [0], [1], [0, 0, 1, 1], [], []>} : vector<12x2xf32>, vector<2x32xf32>, vector<12x32xf32> -> vector<12x32xf32>
    %197 = arith.addf %194, %196 : vector<12x32xf32>
    %198 = vector.extract_strided_slice %0 {offsets = [4, 0], sizes = [1, 32], strides = [1, 1]} : vector<13x32xf32> to vector<1x32xf32>
    %199 = vector.broadcast %198 : vector<1x32xf32> to vector<12x32xf32>
    %200 = arith.addf %197, %199 : vector<12x32xf32>
    %201 = arith.addf %184, %192 : vector<12x32xf32>
    %202 = arith.negf %201 : vector<12x32xf32>
    %203 = math.exp %202 : vector<12x32xf32>
    %cst_71 = arith.constant 1.000000e+00 : f32
    %204 = vector.broadcast %cst_71 : f32 to vector<12x32xf32>
    %205 = arith.addf %204, %203 : vector<12x32xf32>
    %206 = arith.divf %204, %205 : vector<12x32xf32>
    %207 = arith.mulf %206, %200 : vector<12x32xf32>
    %208 = tpu.concatenate %207, %172 in 1 : vector<12x32xf32>, vector<12x32xf32> -> vector<12x64xf32>
    %209 = arith.truncf %208 : vector<12x64xf32> to vector<12x64xbf16>
    %cst_72 = arith.constant dense<0.000000e+00> : vector<8x64xf32>
    %210 = tpu.matmul %80, %209, %cst_72 {dimension_numbers = #tpu.dot_dimension_numbers<[1], [0], [0], [1], [0, 0, 1, 1], [], []>} : vector<8x12xbf16>, vector<12x64xbf16>, vector<8x64xf32> -> vector<8x64xf32>
    %211 = vector.extract_strided_slice %210 {offsets = [0, 0], sizes = [8, 32], strides = [1, 1]} : vector<8x64xf32> to vector<8x32xf32>
    %212 = arith.addf %211, %176 : vector<8x32xf32>
    %213 = vector.extract_strided_slice %0 {offsets = [5, 0], sizes = [1, 32], strides = [1, 1]} : vector<13x32xf32> to vector<1x32xf32>
    %214 = vector.broadcast %213 : vector<1x32xf32> to vector<8x32xf32>
    %215 = arith.addf %212, %214 : vector<8x32xf32>
    %cst_73 = arith.constant 0.000000e+00 : f32
    %216 = vector.broadcast %cst_73 : f32 to vector<8x32xf32>
    %217 = arith.maximumf %215, %216 : vector<8x32xf32>
    %218 = vector.extract_strided_slice %210 {offsets = [0, 32], sizes = [8, 32], strides = [1, 1]} : vector<8x64xf32> to vector<8x32xf32>
    %219 = vector.broadcast %69 : vector<8x1xf32> to vector<8x32xf32>
    %220 = arith.mulf %218, %219 : vector<8x32xf32>
    %c256 = arith.constant 256 : index
    %c0_74 = arith.constant 0 : index
    %221 = vector.load %arg3[%c256, %c0_74] : memref<696x32xf32, #tpu.memory_space<vmem>>, vector<32x32xf32>
    %cst_75 = arith.constant dense<0.000000e+00> : vector<8x32xf32>
    %222 = tpu.matmul %220, %221, %cst_75 {dimension_numbers = #tpu.dot_dimension_numbers<[1], [0], [0], [1], [0, 0, 1, 1], [], []>} : vector<8x32xf32>, vector<32x32xf32>, vector<8x32xf32> -> vector<8x32xf32>
    %c288 = arith.constant 288 : index
    %c0_76 = arith.constant 0 : index
    %223 = vector.load %arg3[%c288, %c0_76] : memref<696x32xf32, #tpu.memory_space<vmem>>, vector<32x32xf32>
    %cst_77 = arith.constant dense<0.000000e+00> : vector<8x32xf32>
    %224 = tpu.matmul %217, %223, %cst_77 {dimension_numbers = #tpu.dot_dimension_numbers<[1], [0], [0], [1], [0, 0, 1, 1], [], []>} : vector<8x32xf32>, vector<32x32xf32>, vector<8x32xf32> -> vector<8x32xf32>
    %225 = arith.addf %222, %224 : vector<8x32xf32>
    %226 = vector.extract_strided_slice %0 {offsets = [6, 0], sizes = [1, 32], strides = [1, 1]} : vector<13x32xf32> to vector<1x32xf32>
    %227 = vector.broadcast %226 : vector<1x32xf32> to vector<8x32xf32>
    %228 = arith.addf %225, %227 : vector<8x32xf32>
    %cst_78 = arith.constant 0.000000e+00 : f32
    %229 = vector.broadcast %cst_78 : f32 to vector<8x32xf32>
    %230 = arith.maximumf %228, %229 : vector<8x32xf32>
    %231 = arith.truncf %170 : vector<16x32xf32> to vector<16x32xbf16>
    %cst_79 = arith.constant dense<0.000000e+00> : vector<10x32xf32>
    %232 = tpu.matmul %48, %231, %cst_79 {dimension_numbers = #tpu.dot_dimension_numbers<[1], [0], [0], [1], [0, 0, 1, 1], [], []>} : vector<10x16xbf16>, vector<16x32xbf16>, vector<10x32xf32> -> vector<10x32xf32>
    %233 = arith.truncf %232 : vector<10x32xf32> to vector<10x32xbf16>
    %cst_80 = arith.constant dense<0.000000e+00> : vector<8x32xf32>
    %234 = tpu.matmul %81, %233, %cst_80 {dimension_numbers = #tpu.dot_dimension_numbers<[1], [0], [0], [1], [0, 0, 1, 1], [], []>} : vector<8x10xbf16>, vector<10x32xbf16>, vector<8x32xf32> -> vector<8x32xf32>
    %235 = vector.broadcast %74 : vector<8x1xf32> to vector<8x32xf32>
    %236 = arith.mulf %234, %235 : vector<8x32xf32>
    %c320 = arith.constant 320 : index
    %c0_81 = arith.constant 0 : index
    %237 = vector.load %arg3[%c320, %c0_81] : memref<696x32xf32, #tpu.memory_space<vmem>>, vector<32x32xf32>
    %cst_82 = arith.constant dense<0.000000e+00> : vector<8x32xf32>
    %238 = tpu.matmul %236, %237, %cst_82 {dimension_numbers = #tpu.dot_dimension_numbers<[1], [0], [0], [1], [0, 0, 1, 1], [], []>} : vector<8x32xf32>, vector<32x32xf32>, vector<8x32xf32> -> vector<8x32xf32>
    %c352 = arith.constant 352 : index
    %c0_83 = arith.constant 0 : index
    %239 = vector.load %arg3[%c352, %c0_83] : memref<696x32xf32, #tpu.memory_space<vmem>>, vector<32x32xf32>
    %cst_84 = arith.constant dense<0.000000e+00> : vector<8x32xf32>
    %240 = tpu.matmul %230, %239, %cst_84 {dimension_numbers = #tpu.dot_dimension_numbers<[1], [0], [0], [1], [0, 0, 1, 1], [], []>} : vector<8x32xf32>, vector<32x32xf32>, vector<8x32xf32> -> vector<8x32xf32>
    %241 = arith.addf %238, %240 : vector<8x32xf32>
    %242 = vector.extract_strided_slice %0 {offsets = [7, 0], sizes = [1, 32], strides = [1, 1]} : vector<13x32xf32> to vector<1x32xf32>
    %243 = vector.broadcast %242 : vector<1x32xf32> to vector<8x32xf32>
    %244 = arith.addf %241, %243 : vector<8x32xf32>
    %cst_85 = arith.constant 0.000000e+00 : f32
    %245 = vector.broadcast %cst_85 : f32 to vector<8x32xf32>
    %246 = arith.maximumf %244, %245 : vector<8x32xf32>
    %c384 = arith.constant 384 : index
    %c0_86 = arith.constant 0 : index
    %247 = vector.load %arg3[%c384, %c0_86] : memref<696x32xf32, #tpu.memory_space<vmem>>, vector<32x32xf32>
    %cst_87 = arith.constant dense<0.000000e+00> : vector<8x32xf32>
    %248 = tpu.matmul %236, %247, %cst_87 {dimension_numbers = #tpu.dot_dimension_numbers<[1], [0], [0], [1], [0, 0, 1, 1], [], []>} : vector<8x32xf32>, vector<32x32xf32>, vector<8x32xf32> -> vector<8x32xf32>
    %c416 = arith.constant 416 : index
    %c0_88 = arith.constant 0 : index
    %249 = vector.load %arg3[%c416, %c0_88] : memref<696x32xf32, #tpu.memory_space<vmem>>, vector<32x32xf32>
    %cst_89 = arith.constant dense<0.000000e+00> : vector<8x32xf32>
    %250 = tpu.matmul %246, %249, %cst_89 {dimension_numbers = #tpu.dot_dimension_numbers<[1], [0], [0], [1], [0, 0, 1, 1], [], []>} : vector<8x32xf32>, vector<32x32xf32>, vector<8x32xf32> -> vector<8x32xf32>
    %251 = arith.addf %248, %250 : vector<8x32xf32>
    %252 = vector.extract_strided_slice %0 {offsets = [8, 0], sizes = [1, 32], strides = [1, 1]} : vector<13x32xf32> to vector<1x32xf32>
    %253 = vector.broadcast %252 : vector<1x32xf32> to vector<8x32xf32>
    %254 = arith.addf %251, %253 : vector<8x32xf32>
    %cst_90 = arith.constant 0.000000e+00 : f32
    %255 = vector.broadcast %cst_90 : f32 to vector<8x32xf32>
    %256 = arith.maximumf %254, %255 : vector<8x32xf32>
    %c448 = arith.constant 448 : index
    %c0_91 = arith.constant 0 : index
    %257 = vector.load %arg3[%c448, %c0_91] : memref<696x32xf32, #tpu.memory_space<vmem>>, vector<32x32xf32>
    %cst_92 = arith.constant dense<0.000000e+00> : vector<8x32xf32>
    %258 = tpu.matmul %256, %257, %cst_92 {dimension_numbers = #tpu.dot_dimension_numbers<[1], [0], [0], [1], [0, 0, 1, 1], [], []>} : vector<8x32xf32>, vector<32x32xf32>, vector<8x32xf32> -> vector<8x32xf32>
    %259 = vector.extract_strided_slice %0 {offsets = [9, 0], sizes = [1, 32], strides = [1, 1]} : vector<13x32xf32> to vector<1x32xf32>
    %260 = vector.broadcast %259 : vector<1x32xf32> to vector<8x32xf32>
    %261 = arith.addf %258, %260 : vector<8x32xf32>
    %262 = arith.truncf %256 : vector<8x32xf32> to vector<8x32xbf16>
    %cst_93 = arith.constant dense<0.000000e+00> : vector<12x32xf32>
    %263 = tpu.matmul %59, %262, %cst_93 {dimension_numbers = #tpu.dot_dimension_numbers<[1], [0], [0], [1], [0, 0, 1, 1], [], []>} : vector<12x8xbf16>, vector<8x32xbf16>, vector<12x32xf32> -> vector<12x32xf32>
    %264 = arith.truncf %263 : vector<12x32xf32> to vector<12x32xbf16>
    %cst_94 = arith.constant dense<0.000000e+00> : vector<8x32xf32>
    %265 = tpu.matmul %82, %264, %cst_94 {dimension_numbers = #tpu.dot_dimension_numbers<[1], [0], [0], [1], [0, 0, 1, 1], [], []>} : vector<8x12xbf16>, vector<12x32xbf16>, vector<8x32xf32> -> vector<8x32xf32>
    %c480 = arith.constant 480 : index
    %c0_95 = arith.constant 0 : index
    %266 = vector.load %arg3[%c480, %c0_95] : memref<696x32xf32, #tpu.memory_space<vmem>>, vector<32x32xf32>
    %cst_96 = arith.constant dense<0.000000e+00> : vector<8x32xf32>
    %267 = tpu.matmul %265, %266, %cst_96 {dimension_numbers = #tpu.dot_dimension_numbers<[1], [0], [0], [1], [0, 0, 1, 1], [], []>} : vector<8x32xf32>, vector<32x32xf32>, vector<8x32xf32> -> vector<8x32xf32>
    %268 = arith.addf %261, %267 : vector<8x32xf32>
    %269 = arith.truncf %265 : vector<8x32xf32> to vector<8x32xbf16>
    %cst_97 = arith.constant dense<0.000000e+00> : vector<12x32xf32>
    %270 = tpu.matmul %59, %269, %cst_97 {dimension_numbers = #tpu.dot_dimension_numbers<[1], [0], [0], [1], [0, 0, 1, 1], [], []>} : vector<12x8xbf16>, vector<8x32xbf16>, vector<12x32xf32> -> vector<12x32xf32>
    %271 = arith.truncf %270 : vector<12x32xf32> to vector<12x32xbf16>
    %cst_98 = arith.constant dense<0.000000e+00> : vector<8x32xf32>
    %272 = tpu.matmul %82, %271, %cst_98 {dimension_numbers = #tpu.dot_dimension_numbers<[1], [0], [0], [1], [0, 0, 1, 1], [], []>} : vector<8x12xbf16>, vector<12x32xbf16>, vector<8x32xf32> -> vector<8x32xf32>
    %c512 = arith.constant 512 : index
    %c0_99 = arith.constant 0 : index
    %273 = vector.load %arg3[%c512, %c0_99] : memref<696x32xf32, #tpu.memory_space<vmem>>, vector<32x32xf32>
    %cst_100 = arith.constant dense<0.000000e+00> : vector<8x32xf32>
    %274 = tpu.matmul %272, %273, %cst_100 {dimension_numbers = #tpu.dot_dimension_numbers<[1], [0], [0], [1], [0, 0, 1, 1], [], []>} : vector<8x32xf32>, vector<32x32xf32>, vector<8x32xf32> -> vector<8x32xf32>
    %275 = arith.addf %268, %274 : vector<8x32xf32>
    %276 = arith.truncf %272 : vector<8x32xf32> to vector<8x32xbf16>
    %cst_101 = arith.constant dense<0.000000e+00> : vector<12x32xf32>
    %277 = tpu.matmul %59, %276, %cst_101 {dimension_numbers = #tpu.dot_dimension_numbers<[1], [0], [0], [1], [0, 0, 1, 1], [], []>} : vector<12x8xbf16>, vector<8x32xbf16>, vector<12x32xf32> -> vector<12x32xf32>
    %278 = arith.truncf %277 : vector<12x32xf32> to vector<12x32xbf16>
    %cst_102 = arith.constant dense<0.000000e+00> : vector<8x32xf32>
    %279 = tpu.matmul %82, %278, %cst_102 {dimension_numbers = #tpu.dot_dimension_numbers<[1], [0], [0], [1], [0, 0, 1, 1], [], []>} : vector<8x12xbf16>, vector<12x32xbf16>, vector<8x32xf32> -> vector<8x32xf32>
    %c544 = arith.constant 544 : index
    %c0_103 = arith.constant 0 : index
    %280 = vector.load %arg3[%c544, %c0_103] : memref<696x32xf32, #tpu.memory_space<vmem>>, vector<32x32xf32>
    %cst_104 = arith.constant dense<0.000000e+00> : vector<8x32xf32>
    %281 = tpu.matmul %279, %280, %cst_104 {dimension_numbers = #tpu.dot_dimension_numbers<[1], [0], [0], [1], [0, 0, 1, 1], [], []>} : vector<8x32xf32>, vector<32x32xf32>, vector<8x32xf32> -> vector<8x32xf32>
    %282 = arith.addf %275, %281 : vector<8x32xf32>
    %cst_105 = arith.constant 0.000000e+00 : f32
    %283 = vector.broadcast %cst_105 : f32 to vector<8x32xf32>
    %284 = arith.maximumf %282, %283 : vector<8x32xf32>
    %285 = arith.truncf %284 : vector<8x32xf32> to vector<8x32xbf16>
    %cst_106 = arith.constant dense<0.000000e+00> : vector<12x32xf32>
    %286 = tpu.matmul %59, %285, %cst_106 {dimension_numbers = #tpu.dot_dimension_numbers<[1], [0], [0], [1], [0, 0, 1, 1], [], []>} : vector<12x8xbf16>, vector<8x32xbf16>, vector<12x32xf32> -> vector<12x32xf32>
    %287 = arith.truncf %286 : vector<12x32xf32> to vector<12x32xbf16>
    %cst_107 = arith.constant dense<0.000000e+00> : vector<8x32xf32>
    %288 = tpu.matmul %82, %287, %cst_107 {dimension_numbers = #tpu.dot_dimension_numbers<[1], [0], [0], [1], [0, 0, 1, 1], [], []>} : vector<8x12xbf16>, vector<12x32xbf16>, vector<8x32xf32> -> vector<8x32xf32>
    %289 = vector.broadcast %79 : vector<8x1xf32> to vector<8x32xf32>
    %290 = arith.mulf %288, %289 : vector<8x32xf32>
    %c576 = arith.constant 576 : index
    %c0_108 = arith.constant 0 : index
    %291 = vector.load %arg3[%c576, %c0_108] : memref<696x32xf32, #tpu.memory_space<vmem>>, vector<32x32xf32>
    %cst_109 = arith.constant dense<0.000000e+00> : vector<8x32xf32>
    %292 = tpu.matmul %290, %291, %cst_109 {dimension_numbers = #tpu.dot_dimension_numbers<[1], [0], [0], [1], [0, 0, 1, 1], [], []>} : vector<8x32xf32>, vector<32x32xf32>, vector<8x32xf32> -> vector<8x32xf32>
    %c608 = arith.constant 608 : index
    %c0_110 = arith.constant 0 : index
    %293 = vector.load %arg3[%c608, %c0_110] : memref<696x32xf32, #tpu.memory_space<vmem>>, vector<32x32xf32>
    %cst_111 = arith.constant dense<0.000000e+00> : vector<8x32xf32>
    %294 = tpu.matmul %284, %293, %cst_111 {dimension_numbers = #tpu.dot_dimension_numbers<[1], [0], [0], [1], [0, 0, 1, 1], [], []>} : vector<8x32xf32>, vector<32x32xf32>, vector<8x32xf32> -> vector<8x32xf32>
    %295 = arith.addf %292, %294 : vector<8x32xf32>
    %296 = vector.extract_strided_slice %0 {offsets = [10, 0], sizes = [1, 32], strides = [1, 1]} : vector<13x32xf32> to vector<1x32xf32>
    %297 = vector.broadcast %296 : vector<1x32xf32> to vector<8x32xf32>
    %298 = arith.addf %295, %297 : vector<8x32xf32>
    %cst_112 = arith.constant 0.000000e+00 : f32
    %299 = vector.broadcast %cst_112 : f32 to vector<8x32xf32>
    %300 = arith.maximumf %298, %299 : vector<8x32xf32>
    %c640 = arith.constant 640 : index
    %c0_113 = arith.constant 0 : index
    %301 = vector.load %arg3[%c640, %c0_113] : memref<696x32xf32, #tpu.memory_space<vmem>>, vector<32x8xf32>
    %cst_114 = arith.constant dense<0.000000e+00> : vector<8x8xf32>
    %302 = tpu.matmul %300, %301, %cst_114 {dimension_numbers = #tpu.dot_dimension_numbers<[1], [0], [0], [1], [0, 0, 1, 1], [], []>} : vector<8x32xf32>, vector<32x8xf32>, vector<8x8xf32> -> vector<8x8xf32>
    %303 = vector.extract_strided_slice %0 {offsets = [11, 0], sizes = [1, 8], strides = [1, 1]} : vector<13x32xf32> to vector<1x8xf32>
    %304 = vector.broadcast %303 : vector<1x8xf32> to vector<8x8xf32>
    %305 = arith.addf %302, %304 : vector<8x8xf32>
    %cst_115 = arith.constant 0.000000e+00 : f32
    %306 = vector.broadcast %cst_115 : f32 to vector<8x8xf32>
    %307 = arith.maximumf %305, %306 : vector<8x8xf32>
    %c672 = arith.constant 672 : index
    %c0_116 = arith.constant 0 : index
    %308 = vector.load %arg3[%c672, %c0_116] : memref<696x32xf32, #tpu.memory_space<vmem>>, vector<1x8xf32>
    %cst_117 = arith.constant dense<0.000000e+00> : vector<1x8xf32>
    %309 = tpu.matmul %308, %307, %cst_117 {dimension_numbers = #tpu.dot_dimension_numbers<[1], [1], [0], [0], [0, 0, 1, 0], [], []>} : vector<1x8xf32>, vector<8x8xf32>, vector<1x8xf32> -> vector<1x8xf32>
    %310 = vector.extract_strided_slice %0 {offsets = [12, 0], sizes = [1, 1], strides = [1, 1]} : vector<13x32xf32> to vector<1x1xf32>
    %311 = vector.broadcast %310 : vector<1x1xf32> to vector<1x8xf32>
    %312 = arith.addf %309, %311 : vector<1x8xf32>
    %cst_118 = arith.constant dense<0xFF800000> : vector<1xf32>
    %313 = vector.multi_reduction <maximumf>, %312, %cst_118 [1] : vector<1x8xf32> to vector<1xf32>
    %314 = vector.shape_cast %313 : vector<1xf32> to vector<1x1xf32>
    %315 = vector.broadcast %314 : vector<1x1xf32> to vector<1x8xf32>
    %316 = arith.subf %312, %315 : vector<1x8xf32>
    %317 = math.exp %316 : vector<1x8xf32>
    %cst_119 = arith.constant dense<0.000000e+00> : vector<1xf32>
    %318 = vector.multi_reduction <add>, %317, %cst_119 [1] : vector<1x8xf32> to vector<1xf32>
    %319 = vector.shape_cast %318 : vector<1xf32> to vector<1x1xf32>
    %320 = math.log %319 : vector<1x1xf32>
    %321 = arith.addf %320, %314 : vector<1x1xf32>
    %322 = vector.broadcast %321 : vector<1x1xf32> to vector<1x8xf32>
    %323 = arith.subf %312, %322 : vector<1x8xf32>
    %c0_120 = arith.constant 0 : index
    %c0_121 = arith.constant 0 : index
    %324 = vector.load %arg4[%c0_120, %c0_121] : memref<1x8xf32, #tpu.memory_space<vmem>>, vector<1x8xf32>
    tpu.vector_store %arg4[%c0_120, %c0_121], %323 {strides = array<i32>} : memref<1x8xf32, #tpu.memory_space<vmem>>, vector<1x8xf32>,
    return
  }
}

</mosaic_0001>

<bundles_post_ra>
// kernel: state_model_encoder_forward.1
= control target key start
LH: loop header
LB: loop body
LE: loop exit
PB: predicated region body
PF: predicated region fallthrough
CT: control target
= control target key end

     0   :  { %v4644_v2 = vmov 0   ;;  %s5397_s0 = inlined_call_operand.vmem [shape: f32[40,8], index: 0, kind: input, shape index: {}]   ;;  %s5398_s1 = inlined_call_operand.vmem [shape: s32[24,6], index: 1, kind: input, shape index: {}]   ;;  %s5399_s2 = inlined_call_operand.vmem [shape: s32[4,24], index: 2, kind: input, shape index: {}]   ;;  %s5400_s3 = inlined_call_operand.vmem [shape: f32[696,32], index: 3, kind: input, shape index: {}]   ;;  %s5401_s4 = inlined_call_operand.hbm [shape: f32[1,8], index: 4, kind: output, shape index: {}]  }
   0x1   :  { %v4685_v0 = vld [vmem:[%s5398_s1] sm:$0xff]  ;;  %v4690_v1 = vld [vmem:[%s5398_s1 + $0x10] sm:$0xff]  ;;  %4561 = vset.pattern.permute.xlu0 %v4644_v2  ;;  %4562 = vset.pattern.permute.xlu1 %v4644_v2 }
   0x2   :  { %9 = vsyncpa [#allocation3], 0  ;;  %38 = vperm.xlu0 %4561, %v4685_v0   ;;  %44 = vperm.xlu1 %4562, %v4690_v1   ;;  %v4699_v3 = vld [vmem:[%s5398_s1 + $0x8] sm:$0xff]  ;;  %v21_v4 = vld [vmem:[%s5397_s0] sm:$0xff]  ;;  %v35_v7 = vlaneseq  ;;  %v4645_v11 = vmov 0.0   ;;  %vm256_vm3 = vcmask 130048  }
   0x3   :  { %v22_v5 = vld [vmem:[%s5397_s0 + $0x8] sm:$0xff]  ;;  %v164_v18 = vld [vmem:[%s5400_s3] sm:$0x7f]  ;;  %vm176_vm4 = vcmask 1046528   ;;  %vm169_vm5 = vcmask 56320   ;;  %vm4646_vm6 = vmmov 0  }
   0x4   :  { %v255_v6 = vpack.c.bf16 %v22_v5, %v21_v4  ;;  %v4708_v8 = vand.u32 127, %v35_v7  ;;  %3999 = vmatprep.subr.msk.mxu0 %vm176_vm4, %v164_v18  ;;  %4001 = vmatprep.mubr.msk.f32.mxu0 %vm169_vm5, %v21_v4  ;;  %v4736_v19 = vshrl.u32 %v35_v7, 7  ;;  %v3714_v22 = vld [vmem:[%s5399_s2] ss:$0 sm:$0xff]  ;;  %vm317_vm9 = vcmask 1043456   ;;  %s4651_s22 = smov 32  }
   0x5   :  { %4000 = vmatpush3.msk.msra.mxu0 %vm176_vm4, %v164_v18  ;;  %vm313_vm10 = vcmask 195584   ;;  %v362_v32 = vld [vmem:[%s5400_s3 + $0x8] sm:$0x7f]  ;;  %v544_v38 = vld [vmem:[%s5400_s3 + $0x10] sm:$0x7f]  ;;  %vm836_vm11 = vcmp.eq.s32.totalorder %v4685_v0, 0 }
   0x6   :  { %41 = vperm.xlu0 %4561, %v4699_v3   ;;  %4004 = vmatprep.subr.bf16.mxu1 %v255_v6  ;;  %v59_v20 = vadd.s32 8, %v4736_v19  ;;  %vm64_vm7 = vcmp.eq.s32.totalorder %v4736_v19, %v3714_v22  ;;  %vm837_vm12 = vcmp.eq.s32.totalorder %v4699_v3, 0  ;;  %vm838_vm13 = vcmp.eq.s32.totalorder %v4690_v1, 0  ;;  %s4654_s17 = smov 96  }
   0x7   :  { %4005 = vmatpush3.bf16.msra.mxu1 %v255_v6  ;;  %4010 = vmatprep.subr.bf16.mxu0 %v4645_v11  ;;  %v3715_v28 = vsel %vm64_vm7, 1.0, %v4645_v11  ;;  %v4647_v46 = vmov 1   ;;  %v3756_v47 = vsel %vm836_vm11, 1.0, %v4645_v11  ;;  %v3757_v48 = vsel %vm837_vm12, 1.0, %v4645_v11 }
   0x8   :  { %4002 = vmatmul.mubr.msk.f32.vlgmr.msra.gmra.mrb[0].mxu0 %vm169_vm5, %v22_v5  ;;  %vm65_vm8 = vcmp.eq.s32.totalorder %v59_v20, %v3714_v22  ;;  %4563 = vset.pattern.permute.xlu1 %v4647_v46  ;;  %v3758_v49 = vsel %vm838_vm13, 1.0, %v4645_v11  ;;  %vm1012_vm14 = vcmp.eq.s32.totalorder %v4685_v0, 1  ;;  %vm1013_vm15 = vcmp.eq.s32.totalorder %v4699_v3, 1  ;;  %v746_v20 = vld [vmem:[%s5400_s3 + $0x78] sm:$0xff] }
   0x9   :  { %4014 = vmatprep.mubr.msk.bf16.mxu0 %vm4646_vm6, %v4645_v11  ;;  %v3716_v29 = vsel %vm65_vm8, 1.0, %v4645_v11  ;;  %683 = vperm.xlu1 %4563, %v4685_v0   ;;  %v4565_v50 = vpack.i.bf16 %v3757_v48, %v3756_v47  ;;  %v3762_v51 = vsel %vm1012_vm14, 1.0, %v4645_v11  ;;  %v3763_v52 = vsel %vm1013_vm15, 1.0, %v4645_v11 }
   0xa   :  { %v4747_v31 = vpack.c.bf16 %v3716_v29, %v3715_v28  ;;  %4564 = vset.pattern.permute.xlu0 %v4647_v46  ;;  %vm1184_vm7 = vcmp.eq.s32.totalorder %v4690_v1, 2  ;;  %v4570_v54 = vpack.i.bf16 %v3763_v52, %v3762_v51  ;;  %vm754_vm14 = vcmask 261120  }
   0xb   :  { %686 = vperm.xlu0 %4564, %v4699_v3   ;;  %v3770_v57 = vsel %vm1184_vm7, 1.0, %v4645_v11  ;;  %vm1552_vm15 = vcmask 15360  }
   0xd   :  { %689 = vperm.xlu1 %4563, %v4690_v1  }
   0xf   :  { %857 = vperm.xlu0 %4564, %v3758_v49  }
  0x11   :  { %4566 = vperm.xlu1 %4563, %v4565_v50  }
  0x15   :  { %4571 = vperm.xlu1 %4563, %v4570_v54  }
  0x81   :  { %v39_v9 = vpop.permute.xlu0 %38  ;;  %v45_v10 = vpop.permute.xlu1 %44 }
  0x82   :  { %vm48_vm0 = vcmp.eq.s32.totalorder %v4708_v8, %v45_v10  ;;  %vm46_vm1 = vcmp.eq.s32.totalorder %v4708_v8, %v39_v9  ;;  %v167_v9 = vsub.s32 0, %v4736_v19  ;;  %v4819_v10 = vld [vmem:[%s5400_s3 + $0x2a8] sm:$0xff] }
  0x83   :  { %v3713_v12 = vsel %vm48_vm0, 1.0, %v4645_v11  ;;  %v3711_v14 = vsel %vm46_vm1, 1.0, %v4645_v11  ;;  %vm1014_vm0 = vcmp.eq.s32.totalorder %v4690_v1, 1  ;;  %vm1182_vm1 = vcmp.eq.s32.totalorder %v4685_v0, 2 }
  0x84   :  { %v4716_v16 = vpack.c.bf16 %v3713_v12, %v3713_v12  ;;  %v3764_v53 = vsel %vm1014_vm0, 1.0, %v4645_v11  ;;  %v3768_v55 = vsel %vm1182_vm1, 1.0, %v4645_v11  ;;  %v168_v12 = vrot.slane %v4819_v10, %v167_v9 }
  0x85   :  { %v42_v13 = vpop.permute.xlu0 %41  ;;  %1033 = vperm.xlu0 %4564, %v3764_v53  }
  0x86   :  { %vm47_vm2 = vcmp.eq.s32.totalorder %v4708_v8, %v42_v13 }
  0x87   :  { %v3712_v15 = vsel %vm47_vm2, 1.0, %v4645_v11  ;;  %vm1183_vm2 = vcmp.eq.s32.totalorder %v4699_v3, 2  ;;  %v4648_v3 = vmov 1.0|1.0  }
  0x88   :  { %v4718_v17 = vpack.c.bf16 %v3712_v15, %v3711_v14  ;;  %v3769_v56 = vsel %vm1183_vm2, 1.0, %v4645_v11  ;;  %v684_v63 = vpop.permute.xlu1 %683  ;;  %vm1638_vm2 = vcmask 64512  }
  0x89   :  { %v4575_v58 = vpack.i.bf16 %v3769_v56, %v3768_v55  ;;  %1203 = vperm.xlu0 %4564, %v3770_v57   ;;  %vm691_vm8 = vcmp.eq.s32.totalorder %v4708_v8, %v684_v63 }
  0x8a   :  { %4006 = vmatprep.mubr.msk.bf16.mxu1 %vm256_vm3, %v4718_v17  ;;  %v687_v1 = vpop.permute.xlu0 %686 }
  0x8b   :  { %4007 = vmatmul.mubr.msk.bf16.vlgmr.msra.gmra.mrb[0].mxu1 %vm256_vm3, %v4716_v16  ;;  %4576 = vperm.xlu1 %4563, %v4575_v58   ;;  %vm692_vm11 = vcmp.eq.s32.totalorder %v4708_v8, %v687_v1 }
  0x8c   :  { %4025 = vmatprep.mubr.msk.bf16.mxu1 %vm256_vm3, %v4718_v17  ;;  %vm3751_vm12 = vmpackc.low %vm692_vm11, %vm691_vm8  ;;  %v690_v4 = vpop.permute.xlu1 %689  ;;  %vm144_vm8 = vcmask 97280   ;;  %vm2054_vm11 = vcmask 1045504  }
  0x8d   :  { %4581 = vset.pattern.permute.xlu0 %v4644_v2  ;;  %vm693_vm13 = vcmp.eq.s32.totalorder %v4708_v8, %v690_v4 }
  0x8e   :  { %v3750_v5 = vsel %vm693_vm13, 1.0, %v4645_v11  ;;  %v858_v49 = vpop.permute.xlu0 %857 }
  0x8f   :  { %4580 = vset.pattern.permute.xlu1 %v4644_v2  ;;  %v701_v6 = vpack.c.bf16 %v3750_v5, %v3750_v5 }
  0x91   :  { %v703_v7 = vsel %vm317_vm9, %v701_v6, 0 }
 0x104   :  { %v1034_v4 = vpop.permute.xlu0 %1033 }
 0x15e   :  { %v4008_v21 = vpop.f32.mrb[0].mxu1 }
 0x15f   :  { %v297_v23 = vpop.f32.mrb[1].mxu1  ;;  %v312_v27 = vpack.c.bf16 %v4008_v21, %v4008_v21  ;;  %v747_v21 = vld [vmem:[%s5400_s3 + $0x80] sm:$0xff] }
 0x160   :  { %v4009_v24 = vpop.f32.mrb[2].mxu1 }
 0x161   :  { %v300_v25 = vpop.f32.mrb[3].mxu1  ;;  %v319_v30 = vsel %vm317_vm9, %v312_v27, 0  ;;  %v4397_v24 = vpack.c.bf16 %v747_v21, %v746_v20  ;;  %v928_v20 = vld [vmem:[%s5400_s3 + $0x30] sm:$0xff] }
 0x162   :  { %v311_v26 = vpack.c.bf16 %v300_v25, %v297_v23  ;;  %v748_v25 = vld [vmem:[%s5400_s3 + $0x88] sm:$0xff] }
 0x164   :  { %4011 = vmatpush3.bf16.msra.mxu0 %v311_v26  ;;  %v749_v26 = vld [vmem:[%s5400_s3 + $0x90] sm:$0xff] }
 0x165   :  { %4012 = vmatprep.subr.bf16.mxu0 %v4645_v11  ;;  %v4401_v27 = vpack.c.bf16 %v749_v26, %v748_v25  ;;  %v1097_v26 = vld [vmem:[%s5400_s3 + $0x48] sm:$0xff] }
 0x168   :  { %4013 = vmatpush3.bf16.msra.mxu0 %v319_v30 }
 0x169   :  { %4018 = vmatprep.subr.msk.mxu0 %vm176_vm4, %v362_v32 }
 0x16b   :  { %4015 = vmatmul.mubr.msk.bf16.vlgmr.msra.gmra.mrb[4].mxu0 %vm313_vm10, %v4747_v31 }
 0x16c   :  { %4019 = vmatpush3.msk.msra.mxu0 %vm176_vm4, %v362_v32 }
 0x16d   :  { %4037 = vmatprep.subr.msk.mxu0 %vm176_vm4, %v544_v38 }
 0x23e   :  { %v355_v33 = vpop.f32.mrb[4].mxu0 }
 0x23f   :  { %v4016_v34 = vpop.f32.mrb[5].mxu0  ;;  %4020 = vmatprep.mubr.msk.f32.mxu0 %vm169_vm5, %v355_v33 }
 0x240   :  { %v358_v35 = vpop.f32.mrb[6].mxu0 }
 0x241   :  { %v449_v36 = vpack.c.bf16 %v358_v35, %v355_v33  ;;  %v4017_v37 = vpop.f32.mrb[7].mxu0  ;;  %4021 = vmatmul.mubr.msk.f32.vlgmr.msra.gmra.mrb[0].mxu0 %vm169_vm5, %v358_v35 }
 0x242   :  { %4038 = vmatpush3.msk.msra.mxu0 %vm176_vm4, %v544_v38  ;;  %v4844_v37 = vld [vmem:[%s5398_s1 + $0x8] sm:$0xf]  ;;  %v925_v38 = vld [vmem:[%s5400_s3 + $0x18] sm:$0xff] }
 0x243   :  { %4023 = vmatprep.subr.bf16.mxu1 %v449_v36 }
 0x244   :  { %4024 = vmatpush3.bf16.msra.mxu1 %v449_v36 }
 0x245   :  { %4029 = vmatprep.subr.bf16.mxu1 %v4645_v11 }
 0x247   :  { %4026 = vmatmul.mubr.msk.bf16.vlgmr.msra.gmra.mrb[4].mxu1 %vm256_vm3, %v4716_v16 }
 0x248   :  { %4033 = vmatprep.mubr.msk.bf16.mxu1 %vm4646_vm6, %v4645_v11 }
 0x31a   :  { %v4027_v39 = vpop.f32.mrb[4].mxu1 }
 0x31b   :  { %v484_v40 = vpop.f32.mrb[5].mxu1  ;;  %v499_v44 = vpack.c.bf16 %v4027_v39, %v4027_v39  ;;  %v926_v39 = vld [vmem:[%s5400_s3 + $0x20] sm:$0xff] }
 0x31c   :  { %v4028_v41 = vpop.f32.mrb[6].mxu1 }
 0x31d   :  { %v487_v42 = vpop.f32.mrb[7].mxu1  ;;  %v501_v45 = vsel %vm317_vm9, %v499_v44, 0  ;;  %v4567_v41 = vpop.permute.xlu1 %4566 }
 0x31e   :  { %v498_v43 = vpack.c.bf16 %v487_v42, %v484_v40  ;;  %v4405_v40 = vpack.c.bf16 %v926_v39, %v925_v38  ;;  %v4569_v48 = vunpack.i.h.bf16 %v4567_v41  ;;  %v1266_v38 = vld [vmem:[%s5400_s3 + $0x60] sm:$0xff] }
 0x320   :  { %4030 = vmatpush3.bf16.msra.mxu1 %v498_v43 }
 0x321   :  { %4031 = vmatprep.subr.bf16.mxu1 %v4645_v11  ;;  %v4572_v42 = vpop.permute.xlu1 %4571 }
 0x322   :  { %v4574_v50 = vunpack.i.h.bf16 %v4572_v42 }
 0x324   :  { %4032 = vmatpush3.bf16.msra.mxu1 %v501_v45  ;;  %v4568_v45 = vunpack.i.l.bf16 %v4567_v41  ;;  %v1267_v41 = vld [vmem:[%s5400_s3 + $0x68] sm:$0xff] }
 0x325   :  { %4048 = vmatprep.subr.bf16.mxu1 %v4645_v11  ;;  %v4577_v43 = vpop.permute.xlu1 %4576 }
 0x326   :  { %v4579_v51 = vunpack.i.h.bf16 %v4577_v43  ;;  %v4578_v52 = vunpack.i.l.bf16 %v4577_v43 }
 0x327   :  { %4034 = vmatmul.mubr.msk.bf16.vlgmr.msra.gmra.mrb[8].mxu1 %vm313_vm10, %v4747_v31 }
 0x328   :  { %4052 = vmatprep.mubr.msk.bf16.mxu1 %vm4646_vm6, %v4645_v11  ;;  %4049 = vmatpush3.bf16.msk.msra.mxu1 %vm3751_vm12, %v4648_v3 }
 0x329   :  { %4050 = vmatprep.subr.bf16.mxu1 %v4645_v11 }
 0x32c   :  { %4051 = vmatpush3.bf16.msra.mxu1 %v703_v7 }
 0x32d   :  { %4067 = vmatprep.subr.bf16.mxu1 %v4645_v11 }
 0x32f   :  { %4053 = vmatmul.mubr.msk.bf16.vlgmr.msra.gmra.mrb[12].mxu1 %vm313_vm10, %v4747_v31 }
 0x330   :  { %4071 = vmatprep.mubr.msk.bf16.mxu1 %vm4646_vm6, %v4645_v11 }
 0x3fa   :  { %v537_v59 = vpop.f32.mrb[8].mxu1 }
 0x3fb   :  { %v4035_v60 = vpop.f32.mrb[9].mxu1  ;;  %4039 = vmatprep.mubr.msk.f32.mxu0 %vm169_vm5, %v537_v59 }
 0x3fc   :  { %v540_v61 = vpop.f32.mrb[10].mxu1 }
 0x3fd   :  { %v4036_v62 = vpop.f32.mrb[11].mxu1  ;;  %4040 = vmatmul.mubr.msk.f32.vlgmr.msra.gmra.mrb[0].mxu0 %vm169_vm5, %v540_v61 }
 0x3fe   :  { %4044 = vmatprep.mubr.msk.bf16.mxu0 %vm256_vm3, %v4718_v17 }
 0x402   :  { %v739_v28 = vpop.f32.mrb[12].mxu1 }
 0x403   :  { %v909_v29 = vmax.f32 %v739_v28, 1.0  ;;  %v4054_v30 = vpop.f32.mrb[13].mxu1 }
 0x404   :  { %v742_v32 = vpop.f32.mrb[14].mxu1 }
 0x405   :  { %4597 = vrcp.f32 %v909_v29  ;;  %v910_v33 = vmax.f32 %v742_v32, 1.0  ;;  %v4055_v34 = vpop.f32.mrb[15].mxu1 }
 0x407   :  { %4599 = vrcp.f32 %v910_v33 }
 0x40f   :  { %v4598_v35 = vpop.eup %4597 }
 0x410   :  { %915 = vperm.xlu1 %4580, %v4598_v35  }
 0x411   :  { %v4600_v36 = vpop.eup %4599 }
 0x412   :  { %920 = vperm.xlu0 %4581, %v4600_v36  }
 0x414   :  { %4582 = vset.pattern.permute.xlu1 %v4647_v46  ;;  %v4573_v46 = vunpack.i.l.bf16 %v4572_v42  ;;  %v1268_v42 = vld [vmem:[%s5400_s3 + $0x70] sm:$0xff] }
 0x415   :  { %1086 = vperm.xlu1 %4582, %v4598_v35  }
 0x419   :  { %1090 = vperm.xlu1 %4582, %v4600_v36  }
 0x4d0   :  { %v4041_v13 = vpop.f32.mrb[0].mxu0 }
 0x4d1   :  { %v4523_v14 = vadd.f32 %v4041_v13, %v168_v12  ;;  %v620_v15 = vpop.f32.mrb[1].mxu0 }
 0x4d2   :  { %v4524_v17 = vadd.f32 %v620_v15, %v168_v12  ;;  %v1204_v12 = vpop.permute.xlu0 %1203 }
 0x4d3   :  { %v632_v18 = vmax.f32 %v4523_v14, 0.0 }
 0x4d4   :  { %v631_v22 = vmax.f32 %v4524_v17, 0.0 }
 0x4d6   :  { %v633_v23 = vpack.c.bf16 %v632_v18, %v631_v22  ;;  %v921_v30 = vpop.permute.xlu0 %920 }
 0x4d8   :  { %4042 = vmatprep.subr.bf16.mxu0 %v633_v23 }
 0x4d9   :  { %4043 = vmatpush3.bf16.msra.mxu0 %v633_v23 }
 0x4da   :  { %4398 = vmatprep.subr.bf16.mxu0 %v4397_v24 }
 0x4dc   :  { %4045 = vmatmul.mubr.msk.bf16.vlgmr.msra.gmra.mrb[8].mxu0 %vm256_vm3, %v4716_v16  ;;  %v4649_v16 = vmov 2  }
 0x4dd   :  { %4400 = vmatpush3.bf16.msra.mxu0 %v4397_v24  ;;  %4064 = vmatprep.mubr.msk.f32.mxu0 %vm754_vm14, %v631_v22  ;;  %v1095_v22 = vld [vmem:[%s5400_s3 + $0x38] sm:$0xff]  ;;  %v916_v24 = vpop.permute.xlu1 %915 }
 0x4de   :  { %4402 = vmatprep.subr.bf16.mxu0 %v4401_v27  ;;  %4583 = vset.pattern.permute.xlu0 %v4649_v16 }
 0x4df   :  { %1256 = vperm.xlu0 %4583, %v4598_v35   ;;  %4584 = vset.pattern.permute.xlu1 %v4649_v16  ;;  %v1265_v16 = vld [vmem:[%s5400_s3 + $0x58] sm:$0xff] }
 0x4e0   :  { %1260 = vperm.xlu1 %4584, %v4600_v36   ;;  %v4421_v39 = vpack.c.bf16 %v1266_v38, %v1265_v16  ;;  %v25_v38 = vld [vmem:[%s5397_s0 + $0x20] sm:$0xf] }
 0x4e1   :  { %4404 = vmatpush3.bf16.msra.mxu0 %v4401_v27  ;;  %v1098_v27 = vld [vmem:[%s5400_s3 + $0x50] sm:$0xff]  ;;  %v1087_v36 = vpop.permute.xlu1 %1086 }
 0x4e2   :  { %4406 = vmatprep.subr.bf16.mxu0 %v4405_v40  ;;  %v4417_v35 = vpack.c.bf16 %v1098_v27, %v1097_v26  ;;  %v1696_v26 = vld [vmem:[%s5400_s3 + $0xf0] sm:$0x3] }
 0x4e3   :  { %75 = vperm.xlu0 %4583, %v4844_v37  }
 0x4e4   :  { %4065 = vmatmul.mubr.msk.f32.vlgmr.msra.gmra.mrb[2].mxu0 %vm754_vm14, %v632_v18  ;;  %72 = vperm.xlu1 %4584, %v4685_v0   ;;  %v927_v18 = vld [vmem:[%s5400_s3 + $0x28] sm:$0xff] }
 0x4e5   :  { %4408 = vmatpush3.bf16.msra.mxu0 %v4405_v40  ;;  %v4409_v21 = vpack.c.bf16 %v928_v20, %v927_v18 }
 0x4e7   :  { %4410 = vmatprep.subr.bf16.mxu0 %v4409_v21 }
 0x4e9   :  { %4412 = vmatpush3.bf16.msra.mxu0 %v4409_v21 }
 0x5af   :  { %v4046_v44 = vpop.f32.mrb[8].mxu0 }
 0x5b0   :  { %v668_v47 = vpop.f32.mrb[9].mxu0  ;;  %v862_v54 = vmul.f32 %v4046_v44, %v858_v49  ;;  %v1038_v5 = vmul.f32 %v4046_v44, %v1034_v4  ;;  %v1208_v13 = vmul.f32 %v4046_v44, %v1204_v12  ;;  %v4425_v49 = vpack.c.bf16 %v1268_v42, %v1267_v41  ;;  %v1695_v41 = vld [vmem:[%s5400_s3 + $0xc0] sm:$0xff]  ;;  %v1864_v42 = vld [vmem:[%s5400_s3 + $0xd8] sm:$0xff] }
 0x5b1   :  { %v4047_v53 = vpop.f32.mrb[10].mxu0  ;;  %v860_v55 = vmul.f32 %v4568_v45, %v668_v47  ;;  %v1036_v56 = vmul.f32 %v4573_v46, %v668_v47  ;;  %v1206_v58 = vmul.f32 %v4578_v52, %v668_v47  ;;  %v1091_v45 = vpop.permute.xlu1 %1090 }
 0x5b2   :  { %v671_v57 = vpop.f32.mrb[11].mxu0  ;;  %v864_v3 = vpack.c.bf16 %v862_v54, %v862_v54  ;;  %v1040_v7 = vpack.c.bf16 %v1038_v5, %v1038_v5  ;;  %v1210_v15 = vpack.c.bf16 %v1208_v13, %v1208_v13 }
 0x5b3   :  { %v861_v59 = vmul.f32 %v4569_v48, %v671_v57  ;;  %v1037_v60 = vmul.f32 %v4574_v50, %v671_v57  ;;  %v1207_v61 = vmul.f32 %v4579_v51, %v671_v57  ;;  %v1257_v50 = vpop.permute.xlu0 %1256 }
 0x5b4   :  { %v866_v6 = vsel %vm317_vm9, %v864_v3, 0  ;;  %v1042_v14 = vsel %vm317_vm9, %v1040_v7, 0  ;;  %v1212_v17 = vsel %vm317_vm9, %v1210_v15, 0 }
 0x5b5   :  { %v863_v62 = vpack.c.bf16 %v861_v59, %v860_v55  ;;  %v1039_v63 = vpack.c.bf16 %v1037_v60, %v1036_v56  ;;  %v1209_v1 = vpack.c.bf16 %v1207_v61, %v1206_v58  ;;  %v1261_v54 = vpop.permute.xlu1 %1260  ;;  %v1399_v58 = vld [vmem:[%s5400_s3 + $0x98] sm:$0x7f]  ;;  %v23_v59 = vld [vmem:[%s5397_s0 + $0x10] sm:$0xff]  ;;  %v4650_v60 = vmov 3   ;;  %v1476_v61 = vld [vmem:[%s5400_s3 + $0xa0] sm:$0x7f] }
 0x5b6   :  { %4585 = vset.pattern.permute.xlu1 %v4650_v60  ;;  %4586 = vset.pattern.permute.xlu0 %v4650_v60 }
 0x5b7   :  { %4068 = vmatpush3.bf16.msra.mxu1 %v863_v62  ;;  %85 = vperm.xlu1 %4585, %v4685_v0   ;;  %v752_v62 = vsub.s32 1, %v4736_v19  ;;  %v76_v3 = vpop.permute.xlu0 %75 }
 0x5b8   :  { %4069 = vmatprep.subr.bf16.mxu1 %v4645_v11  ;;  %88 = vperm.xlu0 %4586, %v4844_v37  }
 0x5bb   :  { %4070 = vmatpush3.bf16.msra.mxu1 %v866_v6 }
 0x5bc   :  { %4086 = vmatprep.subr.bf16.mxu1 %v4645_v11 }
 0x5be   :  { %4072 = vmatmul.mubr.msk.bf16.vlgmr.msra.gmra.mrb[16].mxu1 %vm313_vm10, %v4747_v31 }
 0x5bf   :  { %4087 = vmatpush3.bf16.msra.mxu1 %v1039_v63  ;;  %4090 = vmatprep.mubr.msk.bf16.mxu1 %vm4646_vm6, %v4645_v11  ;;  %v753_v63 = vrot.slane %v4819_v10, %v752_v62 }
 0x5c0   :  { %4088 = vmatprep.subr.bf16.mxu1 %v4645_v11 }
 0x5c3   :  { %4089 = vmatpush3.bf16.msra.mxu1 %v1042_v14 }
 0x5c4   :  { %4105 = vmatprep.subr.bf16.mxu1 %v4645_v11 }
 0x5c6   :  { %4091 = vmatmul.mubr.msk.bf16.vlgmr.msra.gmra.mrb[20].mxu1 %vm313_vm10, %v4747_v31 }
 0x5c7   :  { %4106 = vmatpush3.bf16.msra.mxu1 %v1209_v1  ;;  %4109 = vmatprep.mubr.msk.bf16.mxu1 %vm4646_vm6, %v4645_v11  ;;  %v73_v1 = vpop.permute.xlu1 %72 }
 0x5c8   :  { %4107 = vmatprep.subr.bf16.mxu1 %v4645_v11 }
 0x5cb   :  { %4108 = vmatpush3.bf16.msra.mxu1 %v1212_v17 }
 0x5cc   :  { %4124 = vmatprep.subr.bf16.mxu1 %v4645_v11 }
 0x5ce   :  { %4110 = vmatmul.mubr.msk.bf16.vlgmr.msra.gmra.mrb[24].mxu1 %vm313_vm10, %v4747_v31  ;;  %v1096_v31 = vld [vmem:[%s5400_s3 + $0x40] sm:$0xff]  ;;  %vm1559_vm10 = vcmask 1041408  }
 0x5cf   :  { %4126 = vmatprep.mubr.msk.bf16.mxu1 %vm4646_vm6, %v4645_v11  ;;  %v4413_v23 = vpack.c.bf16 %v1096_v31, %v1095_v22  ;;  %v1551_v22 = vld [vmem:[%s5400_s3 + $0xe8] sm:$0x3]  ;;  %v1866_v31 = vld [vmem:[%s5400_s3 + $0xf8] sm:$0x3] }
 0x5d1   :  { %4414 = vmatprep.subr.bf16.mxu0 %v4413_v23 }
 0x636   :  { %v86_v27 = vpop.permute.xlu1 %85 }
 0x637   :  { %vm90_vm0 = vcmp.eq.s32.totalorder %v4708_v8, %v86_v27 }
 0x691   :  { %v902_v25 = vpop.f32.mrb[16].mxu1 }
 0x692   :  { %v923_v28 = vmul.f32 %v916_v24, %v902_v25  ;;  %v4073_v29 = vpop.f32.mrb[17].mxu1  ;;  %v24_v25 = vld [vmem:[%s5397_s0 + $0x18] sm:$0xff] }
 0x693   :  { %v905_v32 = vpop.f32.mrb[18].mxu1  ;;  %v1862_v29 = vld [vmem:[%s5400_s3 + $0xc8] sm:$0xff] }
 0x694   :  { %v924_v33 = vmul.f32 %v921_v30, %v905_v32  ;;  %v4074_v34 = vpop.f32.mrb[19].mxu1  ;;  %4083 = vmatprep.mubr.msk.f32.mxu0 %vm754_vm14, %v923_v28  ;;  %v89_v28 = vpop.permute.xlu0 %88  ;;  %v1863_v30 = vld [vmem:[%s5400_s3 + $0xd0] sm:$0xff]  ;;  %v3719_v32 = vsel %vm90_vm0, 1.0, %v4645_v11 }
 0x695   :  { %vm91_vm1 = vcmp.eq.s32.totalorder %v4708_v8, %v89_v28  ;;  %v1692_v34 = vld [vmem:[%s5400_s3 + $0xa8] sm:$0xff]  ;;  %v4437_v16 = vpack.c.bf16 %v1863_v30, %v1862_v29 }
 0x696   :  { %4084 = vmatmul.mubr.msk.f32.vlgmr.msra.gmra.mrb[2].mxu0 %vm754_vm14, %v924_v33  ;;  %v3720_v33 = vsel %vm91_vm1, 1.0, %v4645_v11 }
 0x697   :  { %4416 = vmatpush3.bf16.msra.mxu0 %v4413_v23 }
 0x698   :  { %4418 = vmatprep.subr.bf16.mxu0 %v4417_v35 }
 0x699   :  { %v1078_v40 = vpop.f32.mrb[20].mxu1 }
 0x69a   :  { %v1093_v43 = vmul.f32 %v1087_v36, %v1078_v40  ;;  %v4092_v44 = vpop.f32.mrb[21].mxu1  ;;  %v96_v36 = vpack.c.bf16 %v3720_v33, %v3719_v32  ;;  %v1694_v40 = vld [vmem:[%s5400_s3 + $0xb8] sm:$0xff]  ;;  %v2022_v32 = vsub.s32 4, %v4736_v19 }
 0x69b   :  { %v1081_v46 = vpop.f32.mrb[22].mxu1  ;;  %4420 = vmatpush3.bf16.msra.mxu0 %v4417_v35  ;;  %v1693_v35 = vld [vmem:[%s5400_s3 + $0xb0] sm:$0xff]  ;;  %v4433_v44 = vpack.c.bf16 %v1695_v41, %v1694_v40 }
 0x69c   :  { %v1094_v47 = vmul.f32 %v1091_v45, %v1081_v46  ;;  %v4093_v48 = vpop.f32.mrb[23].mxu1  ;;  %4102 = vmatprep.mubr.msk.f32.mxu0 %vm754_vm14, %v1093_v43  ;;  %4422 = vmatprep.subr.bf16.mxu0 %v4421_v39  ;;  %v1865_v43 = vld [vmem:[%s5400_s3 + $0xe0] sm:$0xff]  ;;  %v2023_v33 = vrot.slane %v4819_v10, %v2022_v32  ;;  %v2367_v32 = vld [vmem:[%s5400_s3 + $0x170] sm:$0xff] }
 0x69d   :  { %v4441_v45 = vpack.c.bf16 %v1865_v43, %v1864_v42 }
 0x69e   :  { %4103 = vmatmul.mubr.msk.f32.vlgmr.msra.gmra.mrb[2].mxu0 %vm754_vm14, %v1094_v47 }
 0x69f   :  { %4424 = vmatpush3.bf16.msra.mxu0 %v4421_v39  ;;  %v4429_v39 = vpack.c.bf16 %v1693_v35, %v1692_v34 }
 0x6a0   :  { %4426 = vmatprep.subr.bf16.mxu0 %v4425_v49 }
 0x6a1   :  { %v1248_v51 = vpop.f32.mrb[24].mxu1 }
 0x6a2   :  { %v1263_v52 = vmul.f32 %v1257_v50, %v1248_v51  ;;  %v4111_v53 = vpop.f32.mrb[25].mxu1 }
 0x6a3   :  { %v1251_v55 = vpop.f32.mrb[26].mxu1  ;;  %4428 = vmatpush3.bf16.msra.mxu0 %v4425_v49 }
 0x6a4   :  { %v1264_v56 = vmul.f32 %v1261_v54, %v1251_v55  ;;  %v4112_v57 = vpop.f32.mrb[27].mxu1  ;;  %4121 = vmatprep.mubr.msk.f32.mxu0 %vm754_vm14, %v1263_v52  ;;  %4130 = vmatprep.subr.mxu0 %v4645_v11 }
 0x6a6   :  { %4122 = vmatmul.mubr.msk.f32.vlgmr.msra.gmra.mrb[2].mxu0 %vm754_vm14, %v1264_v56 }
 0x6a7   :  { %4131 = vmatpush3.msk.msra.mxu0 %vm176_vm4, %v1399_v58  ;;  %4132 = vmatprep.mubr.msk.f32.mxu0 %vm4646_vm6, %v4645_v11 }
 0x6a8   :  { %4135 = vmatprep.subr.mxu0 %v4645_v11 }
 0x6aa   :  { %4133 = vmatmul.mubr.msk.f32.vlgmr.msra.gmra.mrb[12].mxu0 %vm169_vm5, %v23_v59 }
 0x6ab   :  { %4137 = vmatprep.mubr.msk.f32.mxu0 %vm4646_vm6, %v4645_v11  ;;  %4136 = vmatpush3.msk.msra.mxu0 %vm176_vm4, %v1476_v61  ;;  %vm77_vm4 = vcmp.eq.s32.totalorder %v4708_v8, %v73_v1  ;;  %v30_v61 = vld [vmem:[%s5398_s1 + $0x8] sm:$0x3]  ;;  %v3721_v1 = vld [vmem:[%s5399_s2 + $0x1] ss:$0 sm:$0xff] }
 0x6ac   :  { %4145 = vmatprep.subr.bf16.mxu0 %v4645_v11  ;;  %v3717_v15 = vsel %vm77_vm4, 1.0, %v4645_v11  ;;  %vm101_vm7 = vcmp.eq.s32.totalorder %v4736_v19, %v3721_v1 }
 0x6ae   :  { %4138 = vmatmul.mubr.msk.f32.vlgmr.msra.gmra.mrb[14].mxu0 %vm169_vm5, %v23_v59  ;;  %vm78_vm5 = vcmp.eq.s32.totalorder %v4708_v8, %v76_v3  ;;  %v3722_v3 = vsel %vm101_vm7, 1.0, %v4645_v11 }
 0x6af   :  { %4147 = vmatprep.mubr.msk.bf16.mxu0 %vm4646_vm6, %v4645_v11  ;;  %v3718_v20 = vsel %vm78_vm5, 1.0, %v4645_v11  ;;  %vm150_vm5 = vcmask 80896  }
 0x6b0   :  { %v83_v24 = vpack.c.bf16 %v3718_v20, %v3717_v15 }
 0x779   :  { %v4123_v4 = vpop.f32.mrb[2].mxu0 }
 0x77a   :  { %v4525_v5 = vadd.f32 %v4123_v4, %v753_v63  ;;  %v1341_v6 = vpop.f32.mrb[3].mxu0  ;;  %v145_v4 = vsel %vm144_vm8, %v3722_v3, 0.0 }
 0x77b   :  { %v4526_v7 = vadd.f32 %v1341_v6, %v753_v63  ;;  %v4652_v63 = vmov 4   ;;  %v1688_v6 = vsub.s32 2, %v4736_v19 }
 0x77c   :  { %v1353_v12 = vmax.f32 %v4525_v5, 0.0  ;;  %4592 = vset.pattern.permute.xlu1 %v4652_v63  ;;  %4593 = vset.pattern.permute.xlu0 %v4652_v63  ;;  %v4653_v5 = vmov 0.0|0.0  }
 0x77d   :  { %v1352_v13 = vmax.f32 %v4526_v7, 0.0  ;;  %v1472_v14 = vpop.f32.mrb[12].mxu0  ;;  %108 = vperm.xlu0 %4593, %v30_v61   ;;  %v1689_v7 = vrot.slane %v4819_v10, %v1688_v6 }
 0x77e   :  { %v1550_v17 = vpack.c.bf16 %v1472_v14, %v1472_v14  ;;  %v4134_v18 = vpop.f32.mrb[13].mxu0 }
 0x77f   :  { %v4943_v21 = vpack.c.bf16 %v1353_v12, %v1352_v13 }
 0x780   :  { %v1643_v23 = vsel %vm317_vm9, %v1550_v17, 0 }
 0x781   :  { %4125 = vmatpush3.bf16.msra.mxu1 %v4943_v21  ;;  %4146 = vmatpush3.bf16.msra.mxu0 %v1643_v23  ;;  %v5005_v46 = vpop.f32.mrb[14].mxu0 }
 0x782   :  { %4140 = vmatprep.subr.msk.mxu1 %vm1559_vm10, %v1551_v22  ;;  %4167 = vmatprep.subr.msk.mxu0 %vm1559_vm10, %v1866_v31  ;;  %v4139_v47 = vpop.f32.mrb[15].mxu0 }
 0x783   :  { %v2110_v47 = vld [vmem:[%s5400_s3 + $0x120] sm:$0xff] }
 0x784   :  { %4127 = vmatmul.mubr.msk.bf16.vlgmr.msra.gmra.mrb[28].mxu1 %vm256_vm3, %v83_v24  ;;  %4148 = vmatmul.mubr.msk.bf16.vlgmr.msra.gmra.mrb[16].mxu0 %vm1638_vm2, %v96_v36 }
 0x785   :  { %4141 = vmatpush3.msk.msra.mxu1 %vm1559_vm10, %v1551_v22  ;;  %4142 = vmatprep.mubr.msk.f32.mxu1 %vm1552_vm15, %v24_v25 }
 0x786   :  { %4151 = vmatprep.subr.msk.mxu1 %vm1559_vm10, %v1696_v26  ;;  %4168 = vmatpush3.msk.msra.mxu0 %vm1559_vm10, %v1866_v31 }
 0x787   :  { %4169 = vmatprep.mubr.msk.f32.mxu0 %vm1552_vm15, %v24_v25  ;;  %4438 = vmatprep.subr.bf16.mxu0 %v4437_v16 }
 0x78c   :  { %4143 = vmatmul.mubr.msk.f32.vlgmr.msra.gmra.mrb[32].mxu1 %vm1552_vm15, %v25_v38  ;;  %4170 = vmatmul.mubr.msk.f32.vlgmr.msra.gmra.mrb[20].mxu0 %vm1552_vm15, %v25_v38 }
 0x78d   :  { %4152 = vmatpush3.msk.msra.mxu1 %vm1559_vm10, %v1696_v26  ;;  %4153 = vmatprep.mubr.msk.f32.mxu1 %vm1552_vm15, %v24_v25 }
 0x78e   :  { %4430 = vmatprep.subr.bf16.mxu1 %v4429_v39  ;;  %4440 = vmatpush3.bf16.msra.mxu0 %v4437_v16 }
 0x78f   :  { %4442 = vmatprep.subr.bf16.mxu0 %v4441_v45 }
 0x790   :  { %4154 = vmatmul.mubr.msk.f32.vlgmr.msra.gmra.mrb[34].mxu1 %vm1552_vm15, %v25_v38 }
 0x791   :  { %4432 = vmatpush3.bf16.msra.mxu1 %v4429_v39 }
 0x792   :  { %4434 = vmatprep.subr.bf16.mxu1 %v4433_v44  ;;  %4444 = vmatpush3.bf16.msra.mxu0 %v4441_v45 }
 0x793   :  { %4451 = vmatprep.subr.bf16.mxu0 %v4653_v5 }
 0x795   :  { %4436 = vmatpush3.bf16.msra.mxu1 %v4433_v44 }
 0x796   :  { %4183 = vmatprep.subr.bf16.mxu1 %v4645_v11 }
 0x857   :  { %v1392_v48 = vpop.f32.mrb[28].mxu1  ;;  %v1679_v53 = vpop.f32.mrb[16].mxu0 }
 0x858   :  { %v4128_v49 = vpop.f32.mrb[29].mxu1  ;;  %4164 = vmatprep.mubr.msk.f32.mxu1 %vm754_vm14, %v1392_v48  ;;  %4180 = vmatprep.mubr.msk.f32.mxu0 %vm754_vm14, %v1392_v48  ;;  %v4149_v54 = vpop.f32.mrb[17].mxu0 }
 0x859   :  { %v1395_v50 = vpop.f32.mrb[30].mxu1  ;;  %v1682_v56 = vpop.f32.mrb[18].mxu0 }
 0x85a   :  { %v4587_v51 = vpack.i.bf16 %v1395_v50, %v1392_v48  ;;  %v4129_v52 = vpop.f32.mrb[31].mxu1  ;;  %4165 = vmatmul.mubr.msk.f32.vlgmr.msra.gmra.mrb[34].mxu1 %vm754_vm14, %v1395_v50  ;;  %4181 = vmatmul.mubr.msk.f32.vlgmr.msra.gmra.mrb[20].mxu0 %vm754_vm14, %v1395_v50  ;;  %v4150_v59 = vpop.f32.mrb[19].mxu0  ;;  %v2111_v48 = vld [vmem:[%s5400_s3 + $0x128] sm:$0xff]  ;;  %v161_v50 = vpack.c.bf16 %v3722_v3, %v3722_v3  ;;  %v2101_v3 = vsub.s32 5, %v4736_v19 }
 0x85b   :  { %4185 = vmatprep.mubr.msk.bf16.mxu1 %vm4646_vm6, %v4645_v11  ;;  %4208 = vmatprep.mubr.msk.f32.mxu0 %vm4646_vm6, %v4645_v11  ;;  %v2112_v52 = vld [vmem:[%s5400_s3 + $0x130] sm:$0xff]  ;;  %v2109_v59 = vld [vmem:[%s5400_s3 + $0x118] sm:$0xff] }
 0x85c   :  { %4588 = vrot.lane.b32.xlu1 %v4587_v51, %s4651_s22  ;;  %v4446_v51 = vpack.c.bf16 %v2111_v48, %v2110_v47  ;;  %v2363_v48 = vld [vmem:[%s5400_s3 + $0x150] sm:$0xff] }
 0x85f   :  { %v4144_v55 = vpop.f32.mrb[32].mxu1 }
 0x860   :  { %v1629_v57 = vpop.f32.mrb[33].mxu1  ;;  %v1683_v58 = vadd.f32 %v4144_v55, %v1682_v56  ;;  %105 = vperm.xlu1 %4592, %v4685_v0   ;;  %v1858_v0 = vsub.s32 3, %v4736_v19  ;;  %v2106_v55 = vld [vmem:[%s5400_s3 + $0x100] sm:$0xff]  ;;  %v2107_v56 = vld [vmem:[%s5400_s3 + $0x108] sm:$0xff] }
 0x861   :  { %v1680_v60 = vadd.f32 %v1679_v53, %v1629_v57  ;;  %v2113_v53 = vld [vmem:[%s5400_s3 + $0x138] sm:$0xff]  ;;  %v2108_v57 = vld [vmem:[%s5400_s3 + $0x110] sm:$0xff] }
 0x862   :  { %v1859_v12 = vrot.slane %v4819_v10, %v1858_v0  ;;  %v1691_v15 = vadd.f32 %v1689_v7, %v1683_v58  ;;  %v4449_v54 = vpack.c.bf16 %v2113_v53, %v2112_v52  ;;  %v4452_v58 = vpack.c.bf16 %v2107_v56, %v2106_v55 }
 0x863   :  { %v1690_v22 = vadd.f32 %v1689_v7, %v1680_v60  ;;  %v4455_v60 = vpack.c.bf16 %v2109_v59, %v2108_v57  ;;  %v109_v7 = vpop.permute.xlu0 %108 }
 0x864   :  { %4453 = vmatpush3.bf16.msra.mxu0 %v4452_v58  ;;  %vm111_vm13 = vcmp.eq.s32.totalorder %v4708_v8, %v109_v7 }
 0x865   :  { %4454 = vmatprep.subr.bf16.mxu0 %v4653_v5 }
 0x868   :  { %4456 = vmatpush3.bf16.msra.mxu0 %v4455_v60  ;;  %v2521_v60 = vld [vmem:[%s5400_s3 + $0x180] sm:$0xff] }
 0x869   :  { %4217 = vmatprep.subr.bf16.mxu0 %v4645_v11 }
 0x884   :  { %146 = vadd.xlane.f32.xlu1 %v145_v4 }
 0x8ce   :  { %v4589_v34 = vpop.permute.xlu1 %4588 }
 0x8cf   :  { %v4591_v39 = vunpack.i.h.bf16 %v4589_v34  ;;  %v4590_v41 = vunpack.i.l.bf16 %v4589_v34 }
 0x8df   :  { %v106_v61 = vpop.permute.xlu1 %105 }
 0x8e0   :  { %vm110_vm12 = vcmp.eq.s32.totalorder %v4708_v8, %v106_v61  ;;  %v2522_v61 = vld [vmem:[%s5400_s3 + $0x188] sm:$0xff] }
 0x911   :  { %v147_v63 = vpop.xlane.xlu1 %146 }
 0x912   :  { %v148_v1 = vmax.f32 %v147_v63, 1.0 }
 0x92d   :  { %v4166_v13 = vpop.f32.mrb[34].mxu1  ;;  %v4182_v14 = vpop.f32.mrb[20].mxu0 }
 0x92e   :  { %v1861_v17 = vadd.f32 %v4166_v13, %v1859_v12  ;;  %v1847_v18 = vpop.f32.mrb[35].mxu1  ;;  %v2011_v20 = vpop.f32.mrb[21].mxu0  ;;  %v2025_v35 = vadd.f32 %v4182_v14, %v2023_v33 }
 0x92f   :  { %v1860_v31 = vadd.f32 %v1859_v12, %v1847_v18  ;;  %v2024_v16 = vadd.f32 %v2023_v33, %v2011_v20  ;;  %v2102_v12 = vrot.slane %v4819_v10, %v2101_v3  ;;  %v2368_v33 = vld [vmem:[%s5400_s3 + $0x178] sm:$0xff]  ;;  %v4476_v3 = vpack.c.bf16 %v2522_v61, %v2521_v60  ;;  %v2854_v60 = vld [vmem:[%s5400_s3 + $0x1e0] sm:$0xff]  ;;  %v2855_v61 = vld [vmem:[%s5400_s3 + $0x1e8] sm:$0xff] }
 0x930   :  { %v2027_v23 = vadd.f32 %v1861_v17, %v1691_v15  ;;  %v4461_v34 = vpack.c.bf16 %v2368_v33, %v2367_v32 }
 0x931   :  { %v2026_v24 = vadd.f32 %v1860_v31, %v1690_v22  ;;  %v3723_v31 = vsel %vm110_vm12, 1.0, %v4645_v11 }
 0x932   :  { %v3794_v25 = vmul.f32 -1.442695, %v2027_v23  ;;  %v3724_v23 = vsel %vm111_vm13, 1.0, %v4645_v11 }
 0x933   :  { %v3793_v26 = vmul.f32 -1.442695, %v2026_v24 }
 0x934   :  { %4601 = vpow2.f32 %v3794_v25  ;;  %v116_v25 = vpack.c.bf16 %v3724_v23, %v3723_v31  ;;  %v2527_v31 = vld [vmem:[%s5400_s3 + $0x1b0] sm:$0xff]  ;;  %v2528_v23 = vld [vmem:[%s5400_s3 + $0x1b8] sm:$0xff] }
 0x935   :  { %4603 = vpow2.f32 %v3793_v26 }
 0x93e   :  { %v4602_v27 = vpop.eup %4601 }
 0x93f   :  { %v4604_v28 = vpop.eup %4603  ;;  %v2035_v29 = vadd.f32 1.0, %v4602_v27 }
 0x940   :  { %v2034_v30 = vadd.f32 1.0, %v4604_v28  ;;  %v2365_v28 = vld [vmem:[%s5400_s3 + $0x160] sm:$0xff] }
 0x941   :  { %4605 = vrcp.f32 %v2035_v29  ;;  %v2366_v29 = vld [vmem:[%s5400_s3 + $0x168] sm:$0xff] }
 0x942   :  { %4607 = vrcp.f32 %v2034_v30  ;;  %v4458_v30 = vpack.c.bf16 %v2366_v29, %v2365_v28  ;;  %v2517_v28 = vsub.s32 7, %v4736_v19 }
 0x943   :  { %4609 = vrcp.f32 %v148_v1 }
 0x944   :  { %v2518_v29 = vrot.slane %v4819_v10, %v2517_v28 }
 0x94b   :  { %v4606_v36 = vpop.eup %4605 }
 0x94c   :  { %v4608_v38 = vpop.eup %4607  ;;  %v2041_v40 = vmul.f32 %v4606_v36, %v2025_v35 }
 0x94d   :  { %v2040_v42 = vmul.f32 %v4608_v38, %v2024_v16  ;;  %v4610_v4 = vpop.eup %4609 }
 0x94e   :  { %v2049_v43 = vsel %vm754_vm14, %v2041_v40, %v4591_v39 }
 0x94f   :  { %v2048_v44 = vsel %vm754_vm14, %v2040_v42, %v4590_v41  ;;  %v2361_v42 = vld [vmem:[%s5400_s3 + $0x140] sm:$0xff] }
 0x950   :  { %v2050_v45 = vpack.c.bf16 %v2049_v43, %v2048_v44  ;;  %v2362_v43 = vld [vmem:[%s5400_s3 + $0x148] sm:$0xff] }
 0x951   :  { %v4464_v47 = vpack.c.bf16 %v2362_v43, %v2361_v42 }
 0x952   :  { %v2056_v49 = vsel %vm2054_vm11, %v2050_v45, 0 }
 0x953   :  { %4184 = vmatpush3.bf16.msra.mxu1 %v2056_v49  ;;  %v2364_v49 = vld [vmem:[%s5400_s3 + $0x158] sm:$0xff] }
 0x954   :  { %4445 = vmatprep.subr.bf16.mxu1 %v4653_v5 }
 0x956   :  { %4186 = vmatmul.mubr.msk.bf16.vlgmr.msra.gmra.mrb[36].mxu1 %vm144_vm8, %v161_v50  ;;  %v4467_v50 = vpack.c.bf16 %v2364_v49, %v2363_v48 }
 0x957   :  { %4447 = vmatpush3.bf16.msra.mxu1 %v4446_v51  ;;  %4197 = vmatprep.mubr.msk.f32.mxu1 %vm4646_vm6, %v4645_v11  ;;  %v2264_v51 = vsub.s32 6, %v4736_v19 }
 0x958   :  { %4448 = vmatprep.subr.bf16.mxu1 %v4653_v5 }
 0x959   :  { %v2265_v52 = vrot.slane %v4819_v10, %v2264_v51  ;;  %v2679_v10 = vld [vmem:[%s5400_s3 + $0x1c8] sm:$0xff] }
 0x95b   :  { %4450 = vmatpush3.bf16.msra.mxu1 %v4449_v54 }
 0x95c   :  { %4211 = vmatprep.subr.bf16.mxu1 %v4645_v11 }
 0xa29   :  { %v2092_v13 = vpop.f32.mrb[36].mxu1 }
 0xa2a   :  { %v2098_v14 = vadd.f32 %v2092_v13, %v5005_v46  ;;  %v2105_v15 = vmul.f32 %v4610_v4, %v2092_v13  ;;  %v4187_v17 = vpop.f32.mrb[37].mxu1  ;;  %v3725_v46 = vld [vmem:[%s5399_s2 + $0x2] ss:$0 sm:$0xff]  ;;  %v2524_v13 = vld [vmem:[%s5400_s3 + $0x198] sm:$0xff] }
 0xa2b   :  { %v2095_v18 = vpop.f32.mrb[38].mxu1  ;;  %vm121_vm4 = vcmp.eq.s32.totalorder %v4736_v19, %v3725_v46  ;;  %v4619_v46 = vld [vmem:[%s5398_s1] sm:$0xff] }
 0xa2c   :  { %v2103_v20 = vadd.f32 %v2102_v12, %v2098_v14  ;;  %2188 = vrot.lane.b32.xlu0 %v2105_v15, %s4654_s17  ;;  %v4188_v22 = vpop.f32.mrb[39].mxu1  ;;  %v3726_v26 = vsel %vm121_vm4, 1.0, %v4645_v11  ;;  %v2523_v12 = vld [vmem:[%s5400_s3 + $0x190] sm:$0xff]  ;;  %v2525_v18 = vld [vmem:[%s5400_s3 + $0x1a0] sm:$0xff] }
 0xa2d   :  { %v162_v45 = vpack.c.bf16 %v3726_v26, %v3726_v26  ;;  %v4479_v17 = vpack.c.bf16 %v2524_v13, %v2523_v12 }
 0xa2e   :  { %v2104_v24 = vmax.f32 %v2103_v20, 0.0  ;;  %v2526_v20 = vld [vmem:[%s5400_s3 + $0x1a8] sm:$0xff] }
 0xa2f   :  { %v4470_v22 = vpack.c.bf16 %v2526_v20, %v2525_v18 }
 0xa30   :  { %4198 = vmatmul.mubr.msk.f32.vlgmr.msra.gmra.mrb[40].mxu1 %vm754_vm14, %v2104_v24  ;;  %v4473_v24 = vpack.c.bf16 %v2528_v23, %v2527_v31  ;;  %v3022_v31 = vld [vmem:[%s5400_s3 + $0x208] sm:$0xff]  ;;  %v3023_v23 = vld [vmem:[%s5400_s3 + $0x210] sm:$0xff] }
 0xa31   :  { %4212 = vmatpush3.bf16.msra.mxu1 %v4943_v21  ;;  %4213 = vmatprep.mubr.msk.bf16.mxu1 %vm4646_vm6, %v4645_v11  ;;  %v151_v21 = vsel %vm150_vm5, %v3726_v26, 0.0  ;;  %v5173_v26 = vld [vmem:[%s5400_s3 + $0x2b0] sm:$0x1f] }
 0xa32   :  { %4457 = vmatprep.subr.bf16.mxu1 %v4653_v5 }
 0xa34   :  { %4214 = vmatmul.mubr.msk.bf16.vlgmr.msra.gmra.mrb[44].mxu1 %vm256_vm3, %v116_v25  ;;  %vm2316_vm3 = vcmask 1044480   ;;  %v4655_v25 = vmov 5  }
 0xa35   :  { %4231 = vmatprep.mubr.msk.f32.mxu1 %vm4646_vm6, %v4645_v11  ;;  %4459 = vmatpush3.bf16.msra.mxu1 %v4458_v30 }
 0xa36   :  { %4460 = vmatprep.subr.bf16.mxu1 %v4653_v5  ;;  %4595 = vset.pattern.permute.xlu0 %v4655_v25 }
 0xa37   :  { %4594 = vset.pattern.permute.xlu1 %v4655_v25  ;;  %v3024_v25 = vld [vmem:[%s5400_s3 + $0x218] sm:$0xff] }
 0xa38   :  { %125 = vperm.xlu1 %4594, %v4619_v46   ;;  %v4497_v46 = vpack.c.bf16 %v3024_v25, %v3023_v23  ;;  %v3359_v23 = vld [vmem:[%s5400_s3 + $0x250] sm:$0xff] }
 0xa39   :  { %4462 = vmatpush3.bf16.msra.mxu1 %v4461_v34 }
 0xa3a   :  { %4469 = vmatprep.subr.bf16.mxu1 %v4653_v5 }
 0xa4b   :  { %152 = vadd.xlane.f32.xlu0 %v151_v21 }
 0xa61   :  { %128 = vperm.xlu0 %4595, %v4844_v37  }
 0xa65   :  { %4596 = vset.pattern.permute.xlu0 %v4644_v2 }
 0xa66   :  { %3602 = vperm.xlu0 %4596, %v5173_v26  }
 0xa9e   :  { %v2189_v27 = vpop.permute.xlu0 %2188 }
 0xa9f   :  { %4209 = vmatmul.mubr.msk.f32.vlgmr.msra.gmra.mrb[22].mxu0 %vm754_vm14, %v2189_v27 }
 0xaa0   :  { %4219 = vmatprep.mubr.msk.bf16.mxu0 %vm4646_vm6, %v4645_v11 }
 0xab7   :  { %v126_v42 = vpop.permute.xlu1 %125 }
 0xab8   :  { %vm130_vm10 = vcmp.eq.s32.totalorder %v4708_v8, %v126_v42  ;;  %v3189_v42 = vld [vmem:[%s5400_s3 + $0x228] sm:$0xff] }
 0xad8   :  { %v153_v58 = vpop.xlane.xlu0 %152 }
 0xad9   :  { %v154_v59 = vmax.f32 %v153_v58, 1.0 }
 0xadb   :  { %4611 = vrcp.f32 %v154_v59 }
 0xae5   :  { %v4612_v63 = vpop.eup %4611 }
 0xb03   :  { %v2183_v35 = vpop.f32.mrb[40].mxu1 }
 0xb04   :  { %v4199_v36 = vpop.f32.mrb[41].mxu1 }
 0xb05   :  { %v2678_v36 = vld [vmem:[%s5400_s3 + $0x1c0] sm:$0xff] }
 0xb07   :  { %v2305_v16 = vpop.f32.mrb[44].mxu1 }
 0xb08   :  { %v4215_v38 = vpop.f32.mrb[45].mxu1 }
 0xb09   :  { %v2308_v39 = vpop.f32.mrb[46].mxu1  ;;  %v2680_v38 = vld [vmem:[%s5400_s3 + $0x1d0] sm:$0xff] }
 0xb0a   :  { %v2312_v40 = vpack.c.bf16 %v2308_v39, %v2305_v16  ;;  %v4216_v41 = vpop.f32.mrb[47].mxu1  ;;  %v4482_v16 = vpack.c.bf16 %v2679_v10, %v2678_v36  ;;  %v2681_v39 = vld [vmem:[%s5400_s3 + $0x1d8] sm:$0xff] }
 0xb0b   :  { %v2675_v41 = vrot.slane %v5173_v26, %v167_v9 }
 0xb0c   :  { %v2318_v44 = vsel %vm2316_vm3, %v2312_v40, 0  ;;  %v4485_v40 = vpack.c.bf16 %v2681_v39, %v2680_v38 }
 0xb0d   :  { %4218 = vmatpush3.bf16.msra.mxu0 %v2318_v44  ;;  %v129_v44 = vpop.permute.xlu0 %128 }
 0xb0e   :  { %4463 = vmatprep.subr.bf16.mxu0 %v4653_v5  ;;  %vm131_vm15 = vcmp.eq.s32.totalorder %v4708_v8, %v129_v44  ;;  %v3729_v8 = vld [vmem:[%s5399_s2 + $0x3] ss:$0 sm:$0xff] }
 0xb0f   :  { %v3728_v51 = vsel %vm131_vm15, 1.0, %v4645_v11  ;;  %vm141_vm0 = vcmp.eq.s32.totalorder %v4736_v19, %v3729_v8 }
 0xb10   :  { %4220 = vmatmul.mubr.msk.bf16.vlgmr.msra.gmra.mrb[24].mxu0 %vm150_vm5, %v162_v45 }
 0xb11   :  { %4465 = vmatpush3.bf16.msra.mxu0 %v4464_v47  ;;  %4242 = vmatprep.mubr.msk.f32.mxu0 %vm4646_vm6, %v4645_v11 }
 0xb12   :  { %4466 = vmatprep.subr.bf16.mxu0 %v4653_v5 }
 0xb15   :  { %4468 = vmatpush3.bf16.msra.mxu0 %v4467_v50  ;;  %v3727_v50 = vsel %vm130_vm10, 1.0, %v4645_v11 }
 0xb16   :  { %4475 = vmatprep.subr.bf16.mxu0 %v4653_v5  ;;  %v5206_v9 = vpack.c.bf16 %v3728_v51, %v3727_v50 }
 0xb72   :  { %v2258_v53 = vpop.f32.mrb[22].mxu0 }
 0xb73   :  { %v2259_v54 = vadd.f32 %v2258_v53, %v2183_v35  ;;  %v4210_v55 = vpop.f32.mrb[23].mxu0 }
 0xb75   :  { %v2266_v56 = vadd.f32 %v2265_v52, %v2259_v54 }
 0xb77   :  { %v2267_v57 = vmax.f32 %v2266_v56, 0.0 }
 0xb79   :  { %4232 = vmatmul.mubr.msk.f32.vlgmr.msra.gmra.mrb[42].mxu1 %vm754_vm14, %v2267_v57  ;;  %v5219_v57 = vsel %vm141_vm0, 1.0, %v4645_v11 }
 0xb7a   :  { %4253 = vmatprep.mubr.msk.f32.mxu1 %vm4646_vm6, %v4645_v11  ;;  %4471 = vmatpush3.bf16.msra.mxu1 %v4470_v22  ;;  %v3021_v22 = vld [vmem:[%s5400_s3 + $0x200] sm:$0xff] }
 0xb7b   :  { %4472 = vmatprep.subr.bf16.mxu1 %v4653_v5 }
 0xb7e   :  { %4474 = vmatpush3.bf16.msra.mxu1 %v4473_v24  ;;  %v4494_v24 = vpack.c.bf16 %v3022_v31, %v3021_v22 }
 0xb7f   :  { %4481 = vmatprep.subr.bf16.mxu1 %v4653_v5 }
 0xbe3   :  { %v2354_v1 = vpop.f32.mrb[24].mxu0 }
 0xbe4   :  { %v2360_v4 = vmul.f32 %v4612_v63, %v2354_v1  ;;  %v4221_v7 = vpop.f32.mrb[25].mxu0  ;;  %v5230_v1 = vpack.c.bf16 %v5219_v57, %v5219_v57 }
 0xbe5   :  { %v2357_v14 = vpop.f32.mrb[26].mxu0  ;;  %v2857_v7 = vld [vmem:[%s5400_s3 + $0x1f8] sm:$0xff] }
 0xbe6   :  { %v4222_v15 = vpop.f32.mrb[27].mxu0  ;;  %4243 = vmatmul.mubr.msk.f32.vlgmr.msra.gmra.mrb[28].mxu0 %vm754_vm14, %v2360_v4 }
 0xbe7   :  { %4477 = vmatpush3.bf16.msra.mxu0 %v4476_v3  ;;  %4264 = vmatprep.mubr.msk.f32.mxu0 %vm4646_vm6, %v4645_v11  ;;  %v4488_v3 = vpack.c.bf16 %v2855_v61, %v2854_v60  ;;  %v3362_v60 = vld [vmem:[%s5400_s3 + $0x268] sm:$0xff] }
 0xbe8   :  { %4478 = vmatprep.subr.bf16.mxu0 %v4653_v5 }
 0xbeb   :  { %4480 = vmatpush3.bf16.msra.mxu0 %v4479_v17 }
 0xbec   :  { %4278 = vmatprep.subr.bf16.mxu0 %v4645_v11 }
 0xbee   :  { %4265 = vmatmul.mubr.msk.f32.vlgmr.msra.gmra.mrb[30].mxu0 %vm754_vm14, %v2360_v4  ;;  %v2856_v4 = vld [vmem:[%s5400_s3 + $0x1f0] sm:$0xff] }
 0xbef   :  { %4280 = vmatprep.mubr.msk.bf16.mxu0 %vm4646_vm6, %v4645_v11  ;;  %v4491_v12 = vpack.c.bf16 %v2857_v7, %v2856_v4  ;;  %v156_v7 = vsel %vm144_vm8, %v5219_v57, 0.0 }
 0xbf0   :  { %157 = vadd.xlane.f32.xlu1 %v156_v7 }
 0xc4c   :  { %v2438_v21 = vpop.f32.mrb[42].mxu1 }
 0xc4d   :  { %v4233_v27 = vpop.f32.mrb[43].mxu1 }
 0xcb9   :  { %v2511_v30 = vpop.f32.mrb[28].mxu0 }
 0xcba   :  { %v2512_v32 = vadd.f32 %v2511_v30, %v2438_v21  ;;  %v4244_v33 = vpop.f32.mrb[29].mxu0 }
 0xcbc   :  { %v2519_v34 = vadd.f32 %v2518_v29, %v2512_v32 }
 0xcbe   :  { %v2520_v37 = vmax.f32 %v2519_v34, 0.0 }
 0xcc0   :  { %4254 = vmatmul.mubr.msk.f32.vlgmr.msra.gmra.mrb[48].mxu1 %vm754_vm14, %v2520_v37 }
 0xcc1   :  { %v2668_v35 = vpop.f32.mrb[30].mxu0  ;;  %4275 = vmatprep.mubr.msk.f32.mxu1 %vm4646_vm6, %v4645_v11  ;;  %4483 = vmatpush3.bf16.msra.mxu1 %v4482_v16 }
 0xcc2   :  { %v4266_v2 = vpop.f32.mrb[31].mxu0  ;;  %4484 = vmatprep.subr.bf16.mxu1 %v4653_v5 }
 0xcc5   :  { %4486 = vmatpush3.bf16.msra.mxu1 %v4485_v40 }
 0xcc6   :  { %4284 = vmatprep.subr.bf16.mxu1 %v4645_v11 }
 0xd93   :  { %v2598_v43 = vpop.f32.mrb[48].mxu1 }
 0xd94   :  { %v2669_v45 = vadd.f32 %v2668_v35, %v2598_v43  ;;  %v4255_v47 = vpop.f32.mrb[49].mxu1 }
 0xd95   :  { %v3191_v47 = vld [vmem:[%s5400_s3 + $0x238] sm:$0xff] }
 0xd96   :  { %v2676_v48 = vadd.f32 %v2675_v41, %v2669_v45  ;;  %v3188_v41 = vld [vmem:[%s5400_s3 + $0x220] sm:$0xff]  ;;  %v3190_v45 = vld [vmem:[%s5400_s3 + $0x230] sm:$0xff] }
 0xd97   :  { %v4500_v44 = vpack.c.bf16 %v3189_v42, %v3188_v41 }
 0xd98   :  { %v2677_v49 = vmax.f32 %v2676_v48, 0.0  ;;  %v4503_v48 = vpack.c.bf16 %v3191_v47, %v3190_v45  ;;  %v3603_v45 = vpop.permute.xlu0 %3602 }
 0xd99   :  { %v3604_v47 = vrot.slane %v3603_v45, 4 }
 0xd9a   :  { %v2759_v52 = vpack.c.bf16 %v2677_v49, %v2677_v49  ;;  %4276 = vmatmul.mubr.msk.f32.vlgmr.msra.gmra.mrb[50].mxu1 %vm754_vm14, %v2677_v49 }
 0xd9b   :  { %4286 = vmatprep.mubr.msk.bf16.mxu1 %vm4646_vm6, %v4645_v11 }
 0xd9c   :  { %v2764_v53 = vsel %vm317_vm9, %v2759_v52, 0 }
 0xd9d   :  { %4279 = vmatpush3.bf16.msra.mxu0 %v2764_v53  ;;  %v2685_v53 = vrot.slane %v5173_v26, %v752_v62  ;;  %v3363_v62 = vld [vmem:[%s5400_s3 + $0x270] sm:$0xff] }
 0xd9e   :  { %4301 = vmatprep.subr.bf16.mxu0 %v4645_v11 }
 0xda0   :  { %4281 = vmatmul.mubr.msk.bf16.vlgmr.msra.gmra.mrb[32].mxu0 %vm1638_vm2, %v5206_v9 }
 0xda1   :  { %4303 = vmatprep.mubr.msk.bf16.mxu0 %vm4646_vm6, %v4645_v11 }
 0xe73   :  { %v2800_v54 = vpop.f32.mrb[32].mxu0 }
 0xe74   :  { %v4282_v55 = vpop.f32.mrb[33].mxu0 }
 0xe75   :  { %v2803_v56 = vpop.f32.mrb[34].mxu0 }
 0xe76   :  { %v2807_v58 = vpack.c.bf16 %v2803_v56, %v2800_v54  ;;  %v4283_v59 = vpop.f32.mrb[35].mxu0 }
 0xe77   :  { %v3361_v59 = vld [vmem:[%s5400_s3 + $0x260] sm:$0xff] }
 0xe78   :  { %v2812_v63 = vsel %vm2054_vm11, %v2807_v58, 0 }
 0xe79   :  { %4285 = vmatpush3.bf16.msra.mxu1 %v2812_v63  ;;  %v4506_v63 = vpack.c.bf16 %v3362_v60, %v3361_v59 }
 0xe7a   :  { %4487 = vmatprep.subr.bf16.mxu1 %v4653_v5 }
 0xe7c   :  { %4287 = vmatmul.mubr.msk.bf16.vlgmr.msra.gmra.mrb[52].mxu1 %vm144_vm8, %v5230_v1 }
 0xe7d   :  { %4489 = vmatpush3.bf16.msra.mxu1 %v4488_v3  ;;  %4298 = vmatprep.mubr.msk.f32.mxu1 %vm4646_vm6, %v4645_v11  ;;  %v3364_v3 = vld [vmem:[%s5400_s3 + $0x278] sm:$0xff] }
 0xe7e   :  { %4490 = vmatprep.subr.bf16.mxu1 %v4653_v5  ;;  %v4509_v4 = vpack.c.bf16 %v3364_v3, %v3363_v62 }
 0xe81   :  { %4492 = vmatpush3.bf16.msra.mxu1 %v4491_v12 }
 0xe82   :  { %4493 = vmatprep.subr.bf16.mxu1 %v4653_v5 }
 0xf4f   :  { %v2848_v13 = vpop.f32.mrb[52].mxu1 }
 0xf50   :  { %v2932_v14 = vpack.c.bf16 %v2848_v13, %v2848_v13  ;;  %v4288_v15 = vpop.f32.mrb[53].mxu1  ;;  %4299 = vmatmul.mubr.msk.f32.vlgmr.msra.gmra.mrb[50].mxu1 %vm754_vm14, %v2848_v13 }
 0xf51   :  { %v2851_v17 = vpop.f32.mrb[54].mxu1  ;;  %4321 = vmatprep.mubr.msk.f32.mxu1 %vm4646_vm6, %v4645_v11  ;;  %4495 = vmatpush3.bf16.msra.mxu1 %v4494_v24  ;;  %v3360_v24 = vld [vmem:[%s5400_s3 + $0x258] sm:$0xff] }
 0xf52   :  { %v4289_v18 = vpop.f32.mrb[55].mxu1  ;;  %v2934_v20 = vsel %vm317_vm9, %v2932_v14, 0  ;;  %4496 = vmatprep.subr.bf16.mxu1 %v4653_v5  ;;  %v3357_v17 = vld [vmem:[%s5400_s3 + $0x240] sm:$0xff]  ;;  %v4515_v25 = vpack.c.bf16 %v3360_v24, %v3359_v23 }
 0xf53   :  { %4302 = vmatpush3.bf16.msra.mxu0 %v2934_v20  ;;  %v3358_v18 = vld [vmem:[%s5400_s3 + $0x248] sm:$0xff] }
 0xf54   :  { %4307 = vmatprep.subr.bf16.mxu0 %v4645_v11  ;;  %v4512_v22 = vpack.c.bf16 %v3358_v18, %v3357_v17 }
 0xf55   :  { %4498 = vmatpush3.bf16.msra.mxu1 %v4497_v46 }
 0xf56   :  { %4304 = vmatmul.mubr.msk.bf16.vlgmr.msra.gmra.mrb[36].mxu0 %vm1638_vm2, %v5206_v9  ;;  %4330 = vmatprep.subr.bf16.mxu1 %v4645_v11 }
 0xf57   :  { %4309 = vmatprep.mubr.msk.bf16.mxu0 %vm4646_vm6, %v4645_v11 }
0x1029   :  { %v2970_v21 = vpop.f32.mrb[36].mxu0 }
0x102a   :  { %v4305_v27 = vpop.f32.mrb[37].mxu0 }
0x102b   :  { %v2973_v28 = vpop.f32.mrb[38].mxu0 }
0x102c   :  { %v2977_v29 = vpack.c.bf16 %v2973_v28, %v2970_v21  ;;  %v4306_v30 = vpop.f32.mrb[39].mxu0 }
0x102e   :  { %v2979_v32 = vsel %vm2054_vm11, %v2977_v29, 0 }
0x102f   :  { %4308 = vmatpush3.bf16.msra.mxu0 %v2979_v32 }
0x1030   :  { %4324 = vmatprep.subr.bf16.mxu0 %v4645_v11 }
0x1032   :  { %4310 = vmatmul.mubr.msk.bf16.vlgmr.msra.gmra.mrb[40].mxu0 %vm144_vm8, %v5230_v1 }
0x1033   :  { %4326 = vmatprep.mubr.msk.bf16.mxu0 %vm4646_vm6, %v4645_v11 }
0x1105   :  { %v3015_v33 = vpop.f32.mrb[40].mxu0 }
0x1106   :  { %v3099_v34 = vpack.c.bf16 %v3015_v33, %v3015_v33  ;;  %v4311_v37 = vpop.f32.mrb[41].mxu0  ;;  %4322 = vmatmul.mubr.msk.f32.vlgmr.msra.gmra.mrb[50].mxu1 %vm754_vm14, %v3015_v33  ;;  %v3517_v33 = vld [vmem:[%s5400_s3 + $0x280] sm:$0xff] }
0x1107   :  { %v3018_v35 = vpop.f32.mrb[42].mxu0  ;;  %4332 = vmatprep.mubr.msk.bf16.mxu1 %vm4646_vm6, %v4645_v11 }
0x1108   :  { %v4312_v2 = vpop.f32.mrb[43].mxu0  ;;  %v3101_v36 = vsel %vm317_vm9, %v3099_v34, 0  ;;  %v3518_v34 = vld [vmem:[%s5400_s3 + $0x288] sm:$0xff]  ;;  %v3519_v35 = vld [vmem:[%s5400_s3 + $0x290] sm:$0xff] }
0x1109   :  { %4325 = vmatpush3.bf16.msra.mxu0 %v3101_v36  ;;  %v4518_v37 = vpack.c.bf16 %v3518_v34, %v3517_v33  ;;  %v3514_v36 = vrot.slane %v5173_v26, %v1688_v6  ;;  %v3599_v6 = vld [vmem:[%s5400_s3 + $0x2a0] sm:$0x1] }
0x110a   :  { %4347 = vmatprep.subr.bf16.mxu0 %v4645_v11 }
0x110c   :  { %4327 = vmatmul.mubr.msk.bf16.vlgmr.msra.gmra.mrb[44].mxu0 %vm1638_vm2, %v5206_v9 }
0x110d   :  { %4349 = vmatprep.mubr.msk.bf16.mxu0 %vm4646_vm6, %v4645_v11 }
0x11df   :  { %v3137_v10 = vpop.f32.mrb[44].mxu0 }
0x11e0   :  { %v4328_v16 = vpop.f32.mrb[45].mxu0 }
0x11e1   :  { %v3140_v38 = vpop.f32.mrb[46].mxu0 }
0x11e2   :  { %v3144_v39 = vpack.c.bf16 %v3140_v38, %v3137_v10  ;;  %v4329_v40 = vpop.f32.mrb[47].mxu0 }
0x11e4   :  { %v3146_v43 = vsel %vm2054_vm11, %v3144_v39, 0 }
0x11e5   :  { %4331 = vmatpush3.bf16.msra.mxu1 %v3146_v43 }
0x11e6   :  { %4499 = vmatprep.subr.bf16.mxu1 %v4653_v5 }
0x11e8   :  { %4333 = vmatmul.mubr.msk.bf16.vlgmr.msra.gmra.mrb[56].mxu1 %vm144_vm8, %v5230_v1 }
0x11e9   :  { %4501 = vmatpush3.bf16.msra.mxu1 %v4500_v44  ;;  %4344 = vmatprep.mubr.msk.f32.mxu1 %vm4646_vm6, %v4645_v11 }
0x11ea   :  { %4502 = vmatprep.subr.bf16.mxu1 %v4653_v5 }
0x11ed   :  { %4504 = vmatpush3.bf16.msra.mxu1 %v4503_v48 }
0x11ee   :  { %4353 = vmatprep.subr.bf16.mxu1 %v4645_v11 }
0x12bb   :  { %v3182_v49 = vpop.f32.mrb[56].mxu1 }
0x12bc   :  { %v4334_v50 = vpop.f32.mrb[57].mxu1  ;;  %4345 = vmatmul.mubr.msk.f32.vlgmr.msra.gmra.mrb[50].mxu1 %vm754_vm14, %v3182_v49 }
0x12bd   :  { %v3185_v51 = vpop.f32.mrb[58].mxu1  ;;  %4355 = vmatprep.mubr.msk.bf16.mxu1 %vm4646_vm6, %v4645_v11 }
0x12be   :  { %v4335_v52 = vpop.f32.mrb[59].mxu1 }
0x138f   :  { %v3261_v8 = vpop.f32.mrb[50].mxu1 }
0x1390   :  { %v4527_v54 = vadd.f32 %v3261_v8, %v2685_v53  ;;  %v4346_v55 = vpop.f32.mrb[51].mxu1 }
0x1392   :  { %v3266_v56 = vmax.f32 %v4527_v54, 0.0 }
0x1394   :  { %v3267_v58 = vpack.c.bf16 %v3266_v56, %v3266_v56 }
0x1396   :  { %v3269_v61 = vsel %vm317_vm9, %v3267_v58, 0 }
0x1397   :  { %4348 = vmatpush3.bf16.msra.mxu0 %v3269_v61 }
0x1398   :  { %4505 = vmatprep.subr.bf16.mxu0 %v4653_v5 }
0x139a   :  { %4350 = vmatmul.mubr.msk.bf16.vlgmr.msra.gmra.mrb[48].mxu0 %vm1638_vm2, %v5206_v9 }
0x139b   :  { %4507 = vmatpush3.bf16.msra.mxu0 %v4506_v63  ;;  %4367 = vmatprep.mubr.msk.f32.mxu0 %vm4646_vm6, %v4645_v11 }
0x139c   :  { %4508 = vmatprep.subr.bf16.mxu0 %v4653_v5 }
0x139f   :  { %4510 = vmatpush3.bf16.msra.mxu0 %v4509_v4 }
0x13a0   :  { %4517 = vmatprep.subr.bf16.mxu0 %v4653_v5 }
0x13a2   :  { %4368 = vmatmul.mubr.msk.f32.vlgmr.msra.gmra.mrb[52].mxu0 %vm754_vm14, %v3266_v56 }
0x13a3   :  { %4389 = vmatprep.mubr.msk.f32.mxu0 %vm4646_vm6, %v4645_v11  ;;  %4519 = vmatpush3.bf16.msra.mxu0 %v4518_v37 }
0x13a4   :  { %4520 = vmatprep.subr.bf16.mxu0 %v4653_v5 }
0x146d   :  { %v3305_v9 = vpop.f32.mrb[48].mxu0 }
0x146e   :  { %v4351_v12 = vpop.f32.mrb[49].mxu0 }
0x146f   :  { %v3308_v13 = vpop.f32.mrb[50].mxu0 }
0x1470   :  { %v3312_v14 = vpack.c.bf16 %v3308_v13, %v3305_v9  ;;  %v4352_v15 = vpop.f32.mrb[51].mxu0 }
0x1472   :  { %v3314_v20 = vsel %vm2054_vm11, %v3312_v14, 0 }
0x1473   :  { %4354 = vmatpush3.bf16.msra.mxu1 %v3314_v20 }
0x1474   :  { %4511 = vmatprep.subr.bf16.mxu1 %v4653_v5 }
0x1475   :  { %v3434_v57 = vpop.f32.mrb[52].mxu0 }
0x1476   :  { %4356 = vmatmul.mubr.msk.bf16.vlgmr.msra.gmra.mrb[60].mxu1 %vm144_vm8, %v5230_v1  ;;  %v4369_v31 = vpop.f32.mrb[53].mxu0  ;;  %v158_v1 = vpop.xlane.xlu1 %157 }
0x1477   :  { %4513 = vmatpush3.bf16.msra.mxu1 %v4512_v22  ;;  %4378 = vmatprep.mubr.msk.f32.mxu1 %vm4646_vm6, %v4645_v11  ;;  %v159_v46 = vmax.f32 %v158_v1, 1.0 }
0x1478   :  { %4514 = vmatprep.subr.bf16.mxu1 %v4653_v5  ;;  %v3524_v5 = vrot.slane %v5173_v26, %v1858_v0 }
0x1479   :  { %4613 = vrcp.f32 %v159_v46 }
0x147b   :  { %4516 = vmatpush3.bf16.msra.mxu1 %v4515_v25 }
0x147c   :  { %4392 = vmatprep.subr.mxu1 %v4645_v11 }
0x1483   :  { %v4614_v21 = vpop.eup %4613 }
0x1549   :  { %v3350_v27 = vpop.f32.mrb[60].mxu1 }
0x154a   :  { %v3356_v28 = vmul.f32 %v4614_v21, %v3350_v27  ;;  %v4357_v29 = vpop.f32.mrb[61].mxu1 }
0x154b   :  { %v3353_v30 = vpop.f32.mrb[62].mxu1 }
0x154c   :  { %4379 = vmatmul.mubr.msk.f32.vlgmr.msra.gmra.mrb[64].mxu1 %vm754_vm14, %v3356_v28  ;;  %v4358_v32 = vpop.f32.mrb[63].mxu1 }
0x154d   :  { %4394 = vmatprep.mubr.msk.f32.mxu1 %vm4646_vm6, %v4645_v11  ;;  %v3520_v11 = vld [vmem:[%s5400_s3 + $0x298] sm:$0xff]  ;;  %vm3682_vm6 = vcmask 57344   ;;  %s4656_s3 = smov [#allocation2]  }
0x154e   :  { %v4521_v2 = vpack.c.bf16 %v3520_v11, %v3519_v35  ;;  %s3703_s29 = sshll.u32 %s4656_s3, 4  ;;  %s3704_s29 = int_to_ptr.vmem [resolvable:$true] %s3703_s29 }
0x154f   :  { %s4620_s30 = scalar_lea.vmem %s3704_s29, 16  ;;  %s4624_s5 = scalar_lea.vmem %s3704_s29, 32 }
0x1550   :  { %4522 = vmatpush3.bf16.msra.mxu0 %v4521_v2  ;;  %p4621_p0 = scmp.ne.s32.totalorder %s3704_s29, %s4620_s30  ;;  %p4625_p1 = scmp.lt.s32.totalorder %s3704_s29, %s3704_s29 }
0x1551   :  { %p4626_p2 = scmp.lt.s32.totalorder %s4624_s5, %s4620_s30 }
0x1553   :  { %p4627_p3 = por %p4626_p2, %p4625_p1 }
0x1555   :  { %p4628_p4 = pnand %p4627_p3, %p4621_p0 }
0x161f   :  { %v3507_v10 = vpop.f32.mrb[64].mxu1 }
0x1620   :  { %v3508_v16 = vadd.f32 %v3507_v10, %v3434_v57  ;;  %v4380_v38 = vpop.f32.mrb[65].mxu1 }
0x1622   :  { %v3515_v39 = vadd.f32 %v3514_v36, %v3508_v16 }
0x1624   :  { %v3516_v40 = vmax.f32 %v3515_v39, 0.0 }
0x1626   :  { %4390 = vmatmul.mubr.msk.f32.vlgmr.msra.gmra.mrb[54].mxu0 %vm754_vm14, %v3516_v40 }
0x16f9   :  { %v3594_v41 = vpop.f32.mrb[54].mxu0 }
0x16fa   :  { %v3595_v42 = vadd.f32 %v3594_v41, %v3524_v5  ;;  %v4391_v43 = vpop.f32.mrb[55].mxu0 }
0x16fc   :  { %v3598_v44 = vmax.f32 %v3595_v42, 0.0 }
0x16fe   :  { %4393 = vmatpush3.xpose.msk.msra.mxu1 %vm1638_vm2, %v3598_v44 }
0x1701   :  { %4395 = vmatmul.mubr.msk.f32.vlgmr.msra.gmra.mrb[66].mxu1 %vm1638_vm2, %v3599_v6 }
0x17d4   :  { %v3678_v48 = vpop.f32.mrb[66].mxu1 }
0x17d5   :  { %v3679_v49 = vadd.f32 %v3678_v48, %v3604_v47  ;;  %v4396_v19 = vpop.f32.mrb[67].mxu1 }
0x17d7   :  { %v3683_v0 = vsel %vm3682_vm6, %v3679_v49, -inf }
0x17d8   :  { %3684 = vmax.xlane.f32.xlu1 %v3683_v0 }
0x1865   :  { %v3685_v26 = vpop.xlane.xlu1 %3684 }
0x1866   :  { %v3686_v50 = vsub.f32 %v3679_v49, %v3685_v26 }
0x1868   :  { %v3687_v51 = vmul.f32 1.442695, %v3686_v50 }
0x186a   :  { %4615 = vpow2.f32 %v3687_v51 }
0x1874   :  { %v4616_v52 = vpop.eup %4615 }
0x1875   :  { %v3689_v53 = vsel %vm3682_vm6, %v4616_v52, 0.0 }
0x1876   :  { %3690 = vadd.xlane.f32.xlu1 %v3689_v53 }
0x1903   :  { %v3691_v8 = vpop.xlane.xlu1 %3690 }
0x1904   :  { %4617 = vlog2.f32 %v3691_v8 }
0x190e   :  { %v4618_v54 = vpop.eup %4617 }
0x190f   :  { %v3693_v55 = vmul.f32 0.6931472, %v4618_v54 }
0x1911   :  { %v3694_v56 = vadd.f32 %v3693_v55, %v3685_v26 }
0x1913   :  { %v3695_v58 = vsub.f32 %v3679_v49, %v3694_v56 }
0x1915   :  { %3696 = vst.msk [vmem:[#allocation2] sm:$0x1] %vm3682_vm6, %v3695_v58 }
0x1916   :  { %4631 = shalt.err (!%p4628_p4)
}
0x1917   :  { %s4632_s8 = scalar_lea.hbm %s5401_s4, 16 }
0x1918   :  { %p4633_p5 = scmp.ne.s32.totalorder %s5401_s4, %s4632_s8  ;;  %p4636_p6 = scmp.lt.u32.totalorder %s4632_s8, %s5401_s4 }
0x191a   :  { %p4638_p7 = pnand %p4636_p6, %p4633_p5 }
0x191c   :  { %4641 = shalt.err (!%p4638_p7)
}
0x191d   :  { %3706 = dma.vmem_to_hbm [thread:$0]  %s3704_s29, 16, %s5401_s4, [#allocation3]  }
0x191e   :  { %4642 = dma.done.wait [#allocation3], 16  }
0x191f   :  { %4643 = vsyncadd [#allocation3], 4294967280 }
0x1920   :  { %3710 = vsyncpa [#allocation3], 1 }

</bundles_post_ra>
